<compile_context>
chip_gen: v7x
topology: tpu7x:2x2x1
jax: 0.10.0
libtpu: 0.0.40
codegen_flags: <defaults>
</compile_context>

<pallas_src>
import functools

import jax
import jax.numpy as jnp
from jax import lax
from jax.experimental import pallas as pl
from jax.experimental.pallas import tpu as pltpu

BN_EPS = 1e-5
_WDT = jnp.bfloat16          # storage / MXU-input dtype of the folded weights


# ----------------------------------------------------------------------------
# Fused Tree kernel: one grid step = NB images, everything resident in VMEM.
# ----------------------------------------------------------------------------
def _tree_kernel(*refs, H, proj):
    if proj:
        (x_ref, wl1, bl1, wsc, bsc, wl2, bl2,
         wr1, br1, wr2, br2, wrt, brt, o_ref) = refs
    else:
        (x_ref, wl1, bl1, wl2, bl2,
         wr1, br1, wr2, br2, wrt, brt, o_ref) = refs

    f32 = jnp.float32
    x = x_ref[...]                                   # (M, W*Cin) f32, M = NB*H
    M = x.shape[0]

    # Per-image H-boundary masks (computed once). Rows of different images are
    # stacked along the sublane axis, so a roll crosses image boundaries and
    # the first/last row of each image must be zero-filled.
    row = lax.broadcasted_iota(jnp.int32, (M, 1), 0) % H
    not_first = (row != 0).astype(f32)               # (M, 1)
    not_last = (row != H - 1).astype(f32)            # (M, 1)

    def shift_up(a):      # rows i-1 within each image, zero at its first row
        return pltpu.roll(a, 1, 0) * not_first

    def shift_dn(a):      # rows i+1 within each image, zero at its last row
        return pltpu.roll(a, M - 1, 0) * not_last    # roll by -1 == roll by M-1

    def conv3x3(a, w3_ref, b_ref):
        # a: (M, W*Cin) f32. w3_ref: (3, W*Cin, W*Cout) bf16 block-banded
        # weights (kx taps + W zero-padding + BN scale folded in). bf16 MXU
        # inputs, f32 accumulation, f32 bias.
        out = jnp.dot(shift_up(a).astype(_WDT), w3_ref[0],
                      preferred_element_type=f32)
        out = out + jnp.dot(a.astype(_WDT), w3_ref[1],
                            preferred_element_type=f32)
        out = out + jnp.dot(shift_dn(a).astype(_WDT), w3_ref[2],
                            preferred_element_type=f32)
        return out + b_ref[...]

    # ---- left BasicBlock: in_ch -> out_ch ----------------------------------
    h = jnp.maximum(conv3x3(x, wl1, bl1), 0.0)
    if proj:   # projection shortcut: 1x1 conv + BN as a block-diagonal matmul
        sc = jnp.dot(x.astype(_WDT), wsc[...], preferred_element_type=f32) + bsc[...]
    else:      # identity shortcut (only valid when in_ch == out_ch)
        sc = x
    out1 = jnp.maximum(conv3x3(h, wl2, bl2) + sc, 0.0)

    # ---- right BasicBlock: out_ch -> out_ch (identity shortcut) ------------
    h2 = jnp.maximum(conv3x3(out1, wr1, br1), 0.0)
    out2 = jnp.maximum(conv3x3(h2, wr2, br2) + out1, 0.0)

    # ---- Root: relu(bn(conv1x1(cat([out1, out2], ch)))), concat folded -----
    root = (jnp.dot(out1.astype(_WDT), wrt[0], preferred_element_type=f32)
            + jnp.dot(out2.astype(_WDT), wrt[1], preferred_element_type=f32)
            + brt[...])
    o_ref[...] = jnp.maximum(root, 0.0)


# ----------------------------------------------------------------------------
# Weight preprocessing (wrapper side, pure XLA, tiny): fold BN scale into the
# conv weights and express 3x3 / 1x1 convs as dense matrices for the
# lane-dense (H, W*C) activation layout. Weights are stored in bf16.
# ----------------------------------------------------------------------------
def _band3x3(w, scale, W):
    """(3,3,Cin,Cout) conv weights + (1,Cout) BN scale -> (3, W*Cin, W*Cout) bf16.

    Band ky maps the row-shifted-by-(ky-1) activation (M, W*Cin) to the output
    (M, W*Cout). Block (j_src, j_out) of band ky is w[ky, (j_src - j_out)+1];
    out-of-band blocks are zero, which implements the zero padding along W.
    """
    wf = (w * scale.reshape(1, 1, 1, -1)).astype(jnp.float32)
    idx = jnp.arange(W)
    cin, cout = w.shape[2], w.shape[3]
    bands = []
    for ky in range(3):
        m = jnp.zeros((W * cin, W * cout), jnp.float32)
        for off in (-1, 0, 1):                      # off = j_src - j_out
            d = ((idx[:, None] - idx[None, :]) == off).astype(jnp.float32)
            m = m + jnp.kron(d, wf[ky, off + 1])
        bands.append(m)
    return jnp.stack(bands, axis=0).astype(_WDT)


def _bdiag1x1(w, W):
    """(Cin,Cout) 1x1 conv (BN scale pre-folded) -> (W*Cin, W*Cout) block-diag bf16."""
    return jnp.kron(jnp.eye(W, dtype=jnp.float32), w.astype(jnp.float32)).astype(_WDT)


def _tile_bias(b, W):
    """(1, Cout) per-channel bias -> (1, W*Cout) f32 bias for the (H, W*C) layout."""
    return jnp.tile(b.astype(jnp.float32), (1, W))


def _pick_batch_block(N, H, target_rows=256):
    """Largest divisor NB of N with NB*H <= target_rows (>= 1): fills the MXU M
    dimension while keeping the activation slab small enough to stay in VMEM."""
    nb = 1
    for d in range(1, N + 1):
        if N % d == 0 and d * H <= target_rows:
            nb = d
    return nb


# ----------------------------------------------------------------------------
# Tree forward (NHWC entry point; NCHW adapter below for PyTorch parity)
# ----------------------------------------------------------------------------
def tree_forward_nhwc(x_nhwc, params):
    N, H, W, Cin = x_nhwc.shape
    C = params["right"]["w1"].shape[-1]
    cin_w = params["left"]["w1"].shape[2]
    proj = cin_w != C
    assert Cin == cin_w, "input channels do not match params"
    assert ("wsc" in params["left"]) == proj, (
        "identity shortcut requires in_ch == out_ch; projection params ('wsc') "
        "must be present iff in_ch != out_ch")
    assert H % 8 == 0, "H must be a multiple of 8 (sublane alignment)"

    WCin, WC = W * Cin, W * C
    NB = _pick_batch_block(N, H)
    ngrid = N // NB

    # Lane-dense 2-D slab (N*H, W*Cin): free reshape of a contiguous NHWC array.
    x2 = x_nhwc.astype(jnp.float32).reshape(N * H, WCin)

    lp, rp = params["left"], params["right"]
    wl1 = _band3x3(lp["w1"], lp["s1"], W); bl1 = _tile_bias(lp["b1"], W)
    wl2 = _band3x3(lp["w2"], lp["s2"], W); bl2 = _tile_bias(lp["b2"], W)
    wr1 = _band3x3(rp["w1"], rp["s1"], W); br1 = _tile_bias(rp["b1"], W)
    wr2 = _band3x3(rp["w2"], rp["s2"], W); br2 = _tile_bias(rp["b2"], W)
    wroot = (params["root_w"] * params["root_s"]).astype(jnp.float32)   # (2C, C)
    wrt = jnp.stack([_bdiag1x1(wroot[:C], W), _bdiag1x1(wroot[C:], W)])
    brt = _tile_bias(params["root_b"], W)

    args = [x2, wl1, bl1]
    if proj:
        args += [_bdiag1x1(lp["wsc"] * lp["ssc"], W), _tile_bias(lp["bsc"], W)]
    args += [wl2, bl2, wr1, br1, wr2, br2, wrt, brt]

    def _resident(a):   # full-block, grid-invariant -> fetched once, stays in VMEM
        return pl.BlockSpec(a.shape, lambda n, _nd=a.ndim: (0,) * _nd)

    in_specs = [pl.BlockSpec((NB * H, WCin), lambda n: (n, 0))]
    in_specs += [_resident(a) for a in args[1:]]

    # FLOP / byte estimate: helps XLA schedule neighbours around the custom call.
    flops = 2 * N * H * (3 * WCin * WC + 9 * WC * WC + 2 * WC * WC)
    if proj:
        flops += 2 * N * H * WCin * WC
    bytes_accessed = sum(int(a.size) * a.dtype.itemsize for a in args) + N * H * WC * 4

    # VMEM budget from actual block sizes: double-buffered operands plus
    # headroom for the in-flight f32 intermediates (floored well below any
    # chip's physical VMEM).
    blk_in = NB * H * WCin * 4
    blk_out = NB * H * WC * 4
    weight_bytes = sum(int(a.size) * a.dtype.itemsize for a in args[1:])
    vmem_limit = int(max(2 * (blk_in + blk_out + weight_bytes) + 32 * blk_out,
                         16 * 1024 * 1024))

    out2d = pl.pallas_call(
        functools.partial(_tree_kernel, H=H, proj=proj),
        out_shape=jax.ShapeDtypeStruct((N * H, WC), jnp.float32),
        grid=(ngrid,),
        in_specs=in_specs,
        out_specs=pl.BlockSpec((NB * H, WC), lambda n: (n, 0)),
        compiler_params=pltpu.CompilerParams(
            # Batch-block axis: independent work; on v7x (2 TCs) a grid with
            # >= 2 steps shards across cores, on v5e/v6e this is a no-op.
            dimension_semantics=("parallel",),
            vmem_limit_bytes=vmem_limit),
        cost_estimate=pl.CostEstimate(flops=flops, transcendentals=0,
                                      bytes_accessed=bytes_accessed),
    )(*args)

    return out2d.reshape(N, H, W, C)


def tree_forward(x_nchw, params):
    """PyTorch-compatible NCHW adapter. In a full network keep activations in
    NHWC end-to-end and convert once at model entry/exit instead of per-Tree."""
    out = tree_forward_nhwc(jnp.transpose(x_nchw, (0, 2, 3, 1)), params)
    return jnp.transpose(out, (0, 3, 1, 2))


# ----------------------------------------------------------------------------
# Deterministic parameter init (BN folded: scale = gamma/sqrt(var+eps), bias = beta)
# ----------------------------------------------------------------------------
def init_params(key, in_ch, out_ch):
    ks = iter(jax.random.split(key, 24))

    def conv3_w(cin, cout):
        return jax.random.normal(next(ks), (3, 3, cin, cout), jnp.float32) * jnp.sqrt(2.0 / (9 * cin))

    def conv1_w(cin, cout):
        return jax.random.normal(next(ks), (cin, cout), jnp.float32) * jnp.sqrt(2.0 / cin)

    def bn_fold(c):
        gamma = 1.0 + 0.1 * jax.random.normal(next(ks), (1, c), jnp.float32)
        beta = 0.1 * jax.random.normal(next(ks), (1, c), jnp.float32)
        scale = gamma / jnp.sqrt(1.0 + BN_EPS)   # running_var=1, running_mean=0
        return scale, beta

    left = {"w1": conv3_w(in_ch, out_ch)}
    left["s1"], left["b1"] = bn_fold(out_ch)
    left["w2"] = conv3_w(out_ch, out_ch)
    left["s2"], left["b2"] = bn_fold(out_ch)
    if in_ch != out_ch:
        left["wsc"] = conv1_w(in_ch, out_ch)
        left["ssc"], left["bsc"] = bn_fold(out_ch)

    right = {"w1": conv3_w(out_ch, out_ch)}
    right["s1"], right["b1"] = bn_fold(out_ch)
    right["w2"] = conv3_w(out_ch, out_ch)
    right["s2"], right["b2"] = bn_fold(out_ch)

    root_w = conv1_w(2 * out_ch, out_ch)
    root_s, root_b = bn_fold(out_ch)
    return {"left": left, "right": right, "root_w": root_w, "root_s": root_s, "root_b": root_b}


# ----------------------------------------------------------------------------
# Pure-JAX reference (lax.conv, f32 HIGHEST) for correctness check
# ----------------------------------------------------------------------------
def _ref_conv3x3(x, w):
    return lax.conv_general_dilated(x, w, (1, 1), "SAME",
                                    dimension_numbers=("NHWC", "HWIO", "NHWC"),
                                    precision=lax.Precision.HIGHEST)


def _ref_block(x, p):
    out = jax.nn.relu(_ref_conv3x3(x, p["w1"]) * p["s1"] + p["b1"])
    if "wsc" in p:
        sc = jnp.einsum("nhwc,cd->nhwd", x, p["wsc"],
                        precision=lax.Precision.HIGHEST) * p["ssc"] + p["bsc"]
    else:
        sc = x
    out = jax.nn.relu(_ref_conv3x3(out, p["w2"]) * p["s2"] + p["b2"] + sc)
    return out


def ref_tree_forward(x_nchw, params):
    x = jnp.transpose(x_nchw, (0, 2, 3, 1)).astype(jnp.float32)
    out1 = _ref_block(x, params["left"])
    out2 = _ref_block(out1, params["right"])
    cat = jnp.concatenate([out1, out2], axis=-1)
    out = jax.nn.relu(jnp.einsum("nhwc,cd->nhwd", cat, params["root_w"],
                                 precision=lax.Precision.HIGHEST)
                      * params["root_s"] + params["root_b"])
    return jnp.transpose(out, (0, 3, 1, 2))


if __name__ == "__main__":
    key = jax.random.PRNGKey(0)
    k_x, k_p = jax.random.split(key)

    N, IN_CH, OUT_CH, H, W = 2, 4, 8, 16, 16
    x = jax.random.normal(k_x, (N, IN_CH, H, W), jnp.float32)   # NCHW, like PyTorch
    params = init_params(k_p, IN_CH, OUT_CH)

    out = jax.block_until_ready(jax.jit(tree_forward)(x, params))
    assert out.shape == (N, OUT_CH, H, W), out.shape

    ref = jax.block_until_ready(ref_tree_forward(x, params))
    max_err = float(jnp.max(jnp.abs(out - ref)))
    scale = float(jnp.max(jnp.abs(ref)))
    # Tolerance justification: matmul inputs are bf16 (weights + activations)
    # with f32 accumulation, across ~5 chained matmul stages; each stage
    # contributes up to ~2^-8 relative input-rounding error, so budget 3% of
    # the output scale (observed error is typically ~10x below this bound).
    assert max_err <= 3e-2 * scale + 1e-3, (
        f"mismatch vs reference: max_err={max_err}, ref_scale={scale}")

    print("KERNEL_OK")
</pallas_src>

<mosaic_0001>
module attributes {stable_mosaic.version = 11 : i64} {
  func.func @_tree_kernel(%arg0: i32, %arg1: memref<32x64xf32, #tpu.memory_space<vmem>>, %arg2: memref<3x64x128xbf16, #tpu.memory_space<vmem>>, %arg3: memref<1x128xf32, #tpu.memory_space<vmem>>, %arg4: memref<64x128xbf16, #tpu.memory_space<vmem>>, %arg5: memref<1x128xf32, #tpu.memory_space<vmem>>, %arg6: memref<3x128x128xbf16, #tpu.memory_space<vmem>>, %arg7: memref<1x128xf32, #tpu.memory_space<vmem>>, %arg8: memref<3x128x128xbf16, #tpu.memory_space<vmem>>, %arg9: memref<1x128xf32, #tpu.memory_space<vmem>>, %arg10: memref<3x128x128xbf16, #tpu.memory_space<vmem>>, %arg11: memref<1x128xf32, #tpu.memory_space<vmem>>, %arg12: memref<2x128x128xbf16, #tpu.memory_space<vmem>>, %arg13: memref<1x128xf32, #tpu.memory_space<vmem>>, %arg14: memref<32x128xf32, #tpu.memory_space<vmem>>) attributes {dimension_semantics = [#tpu.dimension_semantics<parallel>], iteration_bounds = array<i64: 1>, scalar_prefetch = 0 : i64, scratch_operands = 0 : i64, tpu.core_type = #tpu.core_type<tc>, window_params = [{transform_indices = @transform_0, window_bounds = array<i64: 32, 64>}, {pipeline_mode = #tpu.pipeline_mode<synchronous>, transform_indices = @transform_1, window_bounds = array<i64: 3, 64, 128>}, {pipeline_mode = #tpu.pipeline_mode<synchronous>, transform_indices = @transform_2, window_bounds = array<i64: 1, 128>}, {pipeline_mode = #tpu.pipeline_mode<synchronous>, transform_indices = @transform_3, window_bounds = array<i64: 64, 128>}, {pipeline_mode = #tpu.pipeline_mode<synchronous>, transform_indices = @transform_4, window_bounds = array<i64: 1, 128>}, {pipeline_mode = #tpu.pipeline_mode<synchronous>, transform_indices = @transform_5, window_bounds = array<i64: 3, 128, 128>}, {pipeline_mode = #tpu.pipeline_mode<synchronous>, transform_indices = @transform_6, window_bounds = array<i64: 1, 128>}, {pipeline_mode = #tpu.pipeline_mode<synchronous>, transform_indices = @transform_7, window_bounds = array<i64: 3, 128, 128>}, {pipeline_mode = #tpu.pipeline_mode<synchronous>, transform_indices = @transform_8, window_bounds = array<i64: 1, 128>}, {pipeline_mode = #tpu.pipeline_mode<synchronous>, transform_indices = @transform_9, window_bounds = array<i64: 3, 128, 128>}, {pipeline_mode = #tpu.pipeline_mode<synchronous>, transform_indices = @transform_10, window_bounds = array<i64: 1, 128>}, {pipeline_mode = #tpu.pipeline_mode<synchronous>, transform_indices = @transform_11, window_bounds = array<i64: 2, 128, 128>}, {pipeline_mode = #tpu.pipeline_mode<synchronous>, transform_indices = @transform_12, window_bounds = array<i64: 1, 128>}, {transform_indices = @transform_13, window_bounds = array<i64: 32, 128>}]} {
    %c0 = arith.constant 0 : index
    %c0_0 = arith.constant 0 : index
    %0 = vector.load %arg1[%c0, %c0_0] : memref<32x64xf32, #tpu.memory_space<vmem>>, vector<32x64xf32>
    %1 = tpu.iota {dimensions = array<i32: 0>} : vector<32x1xi32>
    %c16_i32 = arith.constant 16 : i32
    %c0_i32 = arith.constant 0 : i32
    %2 = arith.cmpi eq, %c16_i32, %c0_i32 : i32
    %c1_i32 = arith.constant 1 : i32
    %3 = arith.select %2, %c1_i32, %c16_i32 : i32
    %4 = vector.broadcast %3 : i32 to vector<32x1xi32>
    %5 = arith.remsi %1, %4 : vector<32x1xi32>
    %c0_i32_1 = arith.constant 0 : i32
    %6 = vector.broadcast %c0_i32_1 : i32 to vector<32x1xi32>
    %7 = arith.cmpi ne, %5, %6 : vector<32x1xi32>
    %c0_i32_2 = arith.constant 0 : i32
    %8 = vector.broadcast %c0_i32_2 : i32 to vector<32x1xi32>
    %9 = arith.cmpi slt, %5, %8 : vector<32x1xi32>
    %c0_i32_3 = arith.constant 0 : i32
    %10 = arith.cmpi slt, %3, %c0_i32_3 : i32
    %11 = vector.broadcast %10 : i1 to vector<32x1xi1>
    %12 = vector.broadcast %11 : vector<32x1xi1> to vector<32x1xi1>
    %13 = arith.xori %9, %12 : vector<32x1xi1>
    %14 = arith.andi %13, %7 : vector<32x1xi1>
    %15 = vector.broadcast %3 : i32 to vector<32x1xi32>
    %16 = arith.addi %5, %15 : vector<32x1xi32>
    %17 = arith.select %14, %16, %5 : vector<32x1xi1>, vector<32x1xi32>
    %c0_i32_4 = arith.constant 0 : i32
    %18 = vector.broadcast %c0_i32_4 : i32 to vector<32x1xi32>
    %19 = arith.cmpi ne, %17, %18 : vector<32x1xi32>
    %20 = arith.extui %19 : vector<32x1xi1> to vector<32x1xi32>
    %21 = arith.sitofp %20 : vector<32x1xi32> to vector<32x1xf32>
    %c15_i32 = arith.constant 15 : i32
    %22 = vector.broadcast %c15_i32 : i32 to vector<32x1xi32>
    %23 = arith.cmpi ne, %17, %22 : vector<32x1xi32>
    %24 = arith.extui %23 : vector<32x1xi1> to vector<32x1xi32>
    %25 = arith.sitofp %24 : vector<32x1xi32> to vector<32x1xf32>
    %c1_i32_5 = arith.constant 1 : i32
    %26 = tpu.dynamic_rotate %0 by %c1_i32_5 dim 0 : vector<32x64xf32>, i32 -> vector<32x64xf32>
    %27 = vector.broadcast %21 : vector<32x1xf32> to vector<32x64xf32>
    %28 = arith.mulf %26, %27 : vector<32x64xf32>
    %29 = arith.truncf %28 : vector<32x64xf32> to vector<32x64xbf16>
    %c0_6 = arith.constant 0 : index
    %c0_7 = arith.constant 0 : index
    %c0_8 = arith.constant 0 : index
    %30 = vector.load %arg2[%c0_6, %c0_7, %c0_8] : memref<3x64x128xbf16, #tpu.memory_space<vmem>>, vector<1x64x128xbf16>
    %31 = vector.shape_cast %30 : vector<1x64x128xbf16> to vector<64x128xbf16>
    %cst = arith.constant dense<0.000000e+00> : vector<32x128xf32>
    %32 = tpu.matmul %29, %31, %cst {dimension_numbers = #tpu.dot_dimension_numbers<[1], [0], [0], [1], [0, 0, 1, 1], [], []>} : vector<32x64xbf16>, vector<64x128xbf16>, vector<32x128xf32> -> vector<32x128xf32>
    %33 = arith.truncf %0 : vector<32x64xf32> to vector<32x64xbf16>
    %c1 = arith.constant 1 : index
    %c0_9 = arith.constant 0 : index
    %c0_10 = arith.constant 0 : index
    %34 = vector.load %arg2[%c1, %c0_9, %c0_10] : memref<3x64x128xbf16, #tpu.memory_space<vmem>>, vector<1x64x128xbf16>
    %35 = vector.shape_cast %34 : vector<1x64x128xbf16> to vector<64x128xbf16>
    %cst_11 = arith.constant dense<0.000000e+00> : vector<32x128xf32>
    %36 = tpu.matmul %33, %35, %cst_11 {dimension_numbers = #tpu.dot_dimension_numbers<[1], [0], [0], [1], [0, 0, 1, 1], [], []>} : vector<32x64xbf16>, vector<64x128xbf16>, vector<32x128xf32> -> vector<32x128xf32>
    %37 = arith.addf %32, %36 : vector<32x128xf32>
    %c31_i32 = arith.constant 31 : i32
    %38 = tpu.dynamic_rotate %0 by %c31_i32 dim 0 : vector<32x64xf32>, i32 -> vector<32x64xf32>
    %39 = vector.broadcast %25 : vector<32x1xf32> to vector<32x64xf32>
    %40 = arith.mulf %38, %39 : vector<32x64xf32>
    %41 = arith.truncf %40 : vector<32x64xf32> to vector<32x64xbf16>
    %c2 = arith.constant 2 : index
    %c0_12 = arith.constant 0 : index
    %c0_13 = arith.constant 0 : index
    %42 = vector.load %arg2[%c2, %c0_12, %c0_13] : memref<3x64x128xbf16, #tpu.memory_space<vmem>>, vector<1x64x128xbf16>
    %43 = vector.shape_cast %42 : vector<1x64x128xbf16> to vector<64x128xbf16>
    %cst_14 = arith.constant dense<0.000000e+00> : vector<32x128xf32>
    %44 = tpu.matmul %41, %43, %cst_14 {dimension_numbers = #tpu.dot_dimension_numbers<[1], [0], [0], [1], [0, 0, 1, 1], [], []>} : vector<32x64xbf16>, vector<64x128xbf16>, vector<32x128xf32> -> vector<32x128xf32>
    %45 = arith.addf %37, %44 : vector<32x128xf32>
    %c0_15 = arith.constant 0 : index
    %c0_16 = arith.constant 0 : index
    %46 = vector.load %arg3[%c0_15, %c0_16] : memref<1x128xf32, #tpu.memory_space<vmem>>, vector<1x128xf32>
    %47 = vector.broadcast %46 : vector<1x128xf32> to vector<32x128xf32>
    %48 = arith.addf %45, %47 : vector<32x128xf32>
    %cst_17 = arith.constant 0.000000e+00 : f32
    %49 = vector.broadcast %cst_17 : f32 to vector<32x128xf32>
    %50 = arith.maximumf %48, %49 : vector<32x128xf32>
    %51 = arith.truncf %0 : vector<32x64xf32> to vector<32x64xbf16>
    %c0_18 = arith.constant 0 : index
    %c0_19 = arith.constant 0 : index
    %52 = vector.load %arg4[%c0_18, %c0_19] : memref<64x128xbf16, #tpu.memory_space<vmem>>, vector<64x128xbf16>
    %cst_20 = arith.constant dense<0.000000e+00> : vector<32x128xf32>
    %53 = tpu.matmul %51, %52, %cst_20 {dimension_numbers = #tpu.dot_dimension_numbers<[1], [0], [0], [1], [0, 0, 1, 1], [], []>} : vector<32x64xbf16>, vector<64x128xbf16>, vector<32x128xf32> -> vector<32x128xf32>
    %c0_21 = arith.constant 0 : index
    %c0_22 = arith.constant 0 : index
    %54 = vector.load %arg5[%c0_21, %c0_22] : memref<1x128xf32, #tpu.memory_space<vmem>>, vector<1x128xf32>
    %55 = vector.broadcast %54 : vector<1x128xf32> to vector<32x128xf32>
    %56 = arith.addf %53, %55 : vector<32x128xf32>
    %c1_i32_23 = arith.constant 1 : i32
    %57 = tpu.dynamic_rotate %50 by %c1_i32_23 dim 0 : vector<32x128xf32>, i32 -> vector<32x128xf32>
    %58 = vector.broadcast %21 : vector<32x1xf32> to vector<32x128xf32>
    %59 = arith.mulf %57, %58 : vector<32x128xf32>
    %60 = arith.truncf %59 : vector<32x128xf32> to vector<32x128xbf16>
    %c0_24 = arith.constant 0 : index
    %c0_25 = arith.constant 0 : index
    %c0_26 = arith.constant 0 : index
    %61 = vector.load %arg6[%c0_24, %c0_25, %c0_26] : memref<3x128x128xbf16, #tpu.memory_space<vmem>>, vector<1x128x128xbf16>
    %62 = vector.shape_cast %61 : vector<1x128x128xbf16> to vector<128x128xbf16>
    %cst_27 = arith.constant dense<0.000000e+00> : vector<32x128xf32>
    %63 = tpu.matmul %60, %62, %cst_27 {dimension_numbers = #tpu.dot_dimension_numbers<[1], [0], [0], [1], [0, 0, 1, 1], [], []>} : vector<32x128xbf16>, vector<128x128xbf16>, vector<32x128xf32> -> vector<32x128xf32>
    %64 = arith.truncf %50 : vector<32x128xf32> to vector<32x128xbf16>
    %c1_28 = arith.constant 1 : index
    %c0_29 = arith.constant 0 : index
    %c0_30 = arith.constant 0 : index
    %65 = vector.load %arg6[%c1_28, %c0_29, %c0_30] : memref<3x128x128xbf16, #tpu.memory_space<vmem>>, vector<1x128x128xbf16>
    %66 = vector.shape_cast %65 : vector<1x128x128xbf16> to vector<128x128xbf16>
    %cst_31 = arith.constant dense<0.000000e+00> : vector<32x128xf32>
    %67 = tpu.matmul %64, %66, %cst_31 {dimension_numbers = #tpu.dot_dimension_numbers<[1], [0], [0], [1], [0, 0, 1, 1], [], []>} : vector<32x128xbf16>, vector<128x128xbf16>, vector<32x128xf32> -> vector<32x128xf32>
    %68 = arith.addf %63, %67 : vector<32x128xf32>
    %c31_i32_32 = arith.constant 31 : i32
    %69 = tpu.dynamic_rotate %50 by %c31_i32_32 dim 0 : vector<32x128xf32>, i32 -> vector<32x128xf32>
    %70 = vector.broadcast %25 : vector<32x1xf32> to vector<32x128xf32>
    %71 = arith.mulf %69, %70 : vector<32x128xf32>
    %72 = arith.truncf %71 : vector<32x128xf32> to vector<32x128xbf16>
    %c2_33 = arith.constant 2 : index
    %c0_34 = arith.constant 0 : index
    %c0_35 = arith.constant 0 : index
    %73 = vector.load %arg6[%c2_33, %c0_34, %c0_35] : memref<3x128x128xbf16, #tpu.memory_space<vmem>>, vector<1x128x128xbf16>
    %74 = vector.shape_cast %73 : vector<1x128x128xbf16> to vector<128x128xbf16>
    %cst_36 = arith.constant dense<0.000000e+00> : vector<32x128xf32>
    %75 = tpu.matmul %72, %74, %cst_36 {dimension_numbers = #tpu.dot_dimension_numbers<[1], [0], [0], [1], [0, 0, 1, 1], [], []>} : vector<32x128xbf16>, vector<128x128xbf16>, vector<32x128xf32> -> vector<32x128xf32>
    %76 = arith.addf %68, %75 : vector<32x128xf32>
    %c0_37 = arith.constant 0 : index
    %c0_38 = arith.constant 0 : index
    %77 = vector.load %arg7[%c0_37, %c0_38] : memref<1x128xf32, #tpu.memory_space<vmem>>, vector<1x128xf32>
    %78 = vector.broadcast %77 : vector<1x128xf32> to vector<32x128xf32>
    %79 = arith.addf %76, %78 : vector<32x128xf32>
    %80 = arith.addf %79, %56 : vector<32x128xf32>
    %cst_39 = arith.constant 0.000000e+00 : f32
    %81 = vector.broadcast %cst_39 : f32 to vector<32x128xf32>
    %82 = arith.maximumf %80, %81 : vector<32x128xf32>
    %c1_i32_40 = arith.constant 1 : i32
    %83 = tpu.dynamic_rotate %82 by %c1_i32_40 dim 0 : vector<32x128xf32>, i32 -> vector<32x128xf32>
    %84 = vector.broadcast %21 : vector<32x1xf32> to vector<32x128xf32>
    %85 = arith.mulf %83, %84 : vector<32x128xf32>
    %86 = arith.truncf %85 : vector<32x128xf32> to vector<32x128xbf16>
    %c0_41 = arith.constant 0 : index
    %c0_42 = arith.constant 0 : index
    %c0_43 = arith.constant 0 : index
    %87 = vector.load %arg8[%c0_41, %c0_42, %c0_43] : memref<3x128x128xbf16, #tpu.memory_space<vmem>>, vector<1x128x128xbf16>
    %88 = vector.shape_cast %87 : vector<1x128x128xbf16> to vector<128x128xbf16>
    %cst_44 = arith.constant dense<0.000000e+00> : vector<32x128xf32>
    %89 = tpu.matmul %86, %88, %cst_44 {dimension_numbers = #tpu.dot_dimension_numbers<[1], [0], [0], [1], [0, 0, 1, 1], [], []>} : vector<32x128xbf16>, vector<128x128xbf16>, vector<32x128xf32> -> vector<32x128xf32>
    %90 = arith.truncf %82 : vector<32x128xf32> to vector<32x128xbf16>
    %c1_45 = arith.constant 1 : index
    %c0_46 = arith.constant 0 : index
    %c0_47 = arith.constant 0 : index
    %91 = vector.load %arg8[%c1_45, %c0_46, %c0_47] : memref<3x128x128xbf16, #tpu.memory_space<vmem>>, vector<1x128x128xbf16>
    %92 = vector.shape_cast %91 : vector<1x128x128xbf16> to vector<128x128xbf16>
    %cst_48 = arith.constant dense<0.000000e+00> : vector<32x128xf32>
    %93 = tpu.matmul %90, %92, %cst_48 {dimension_numbers = #tpu.dot_dimension_numbers<[1], [0], [0], [1], [0, 0, 1, 1], [], []>} : vector<32x128xbf16>, vector<128x128xbf16>, vector<32x128xf32> -> vector<32x128xf32>
    %94 = arith.addf %89, %93 : vector<32x128xf32>
    %c31_i32_49 = arith.constant 31 : i32
    %95 = tpu.dynamic_rotate %82 by %c31_i32_49 dim 0 : vector<32x128xf32>, i32 -> vector<32x128xf32>
    %96 = vector.broadcast %25 : vector<32x1xf32> to vector<32x128xf32>
    %97 = arith.mulf %95, %96 : vector<32x128xf32>
    %98 = arith.truncf %97 : vector<32x128xf32> to vector<32x128xbf16>
    %c2_50 = arith.constant 2 : index
    %c0_51 = arith.constant 0 : index
    %c0_52 = arith.constant 0 : index
    %99 = vector.load %arg8[%c2_50, %c0_51, %c0_52] : memref<3x128x128xbf16, #tpu.memory_space<vmem>>, vector<1x128x128xbf16>
    %100 = vector.shape_cast %99 : vector<1x128x128xbf16> to vector<128x128xbf16>
    %cst_53 = arith.constant dense<0.000000e+00> : vector<32x128xf32>
    %101 = tpu.matmul %98, %100, %cst_53 {dimension_numbers = #tpu.dot_dimension_numbers<[1], [0], [0], [1], [0, 0, 1, 1], [], []>} : vector<32x128xbf16>, vector<128x128xbf16>, vector<32x128xf32> -> vector<32x128xf32>
    %102 = arith.addf %94, %101 : vector<32x128xf32>
    %c0_54 = arith.constant 0 : index
    %c0_55 = arith.constant 0 : index
    %103 = vector.load %arg9[%c0_54, %c0_55] : memref<1x128xf32, #tpu.memory_space<vmem>>, vector<1x128xf32>
    %104 = vector.broadcast %103 : vector<1x128xf32> to vector<32x128xf32>
    %105 = arith.addf %102, %104 : vector<32x128xf32>
    %cst_56 = arith.constant 0.000000e+00 : f32
    %106 = vector.broadcast %cst_56 : f32 to vector<32x128xf32>
    %107 = arith.maximumf %105, %106 : vector<32x128xf32>
    %c1_i32_57 = arith.constant 1 : i32
    %108 = tpu.dynamic_rotate %107 by %c1_i32_57 dim 0 : vector<32x128xf32>, i32 -> vector<32x128xf32>
    %109 = vector.broadcast %21 : vector<32x1xf32> to vector<32x128xf32>
    %110 = arith.mulf %108, %109 : vector<32x128xf32>
    %111 = arith.truncf %110 : vector<32x128xf32> to vector<32x128xbf16>
    %c0_58 = arith.constant 0 : index
    %c0_59 = arith.constant 0 : index
    %c0_60 = arith.constant 0 : index
    %112 = vector.load %arg10[%c0_58, %c0_59, %c0_60] : memref<3x128x128xbf16, #tpu.memory_space<vmem>>, vector<1x128x128xbf16>
    %113 = vector.shape_cast %112 : vector<1x128x128xbf16> to vector<128x128xbf16>
    %cst_61 = arith.constant dense<0.000000e+00> : vector<32x128xf32>
    %114 = tpu.matmul %111, %113, %cst_61 {dimension_numbers = #tpu.dot_dimension_numbers<[1], [0], [0], [1], [0, 0, 1, 1], [], []>} : vector<32x128xbf16>, vector<128x128xbf16>, vector<32x128xf32> -> vector<32x128xf32>
    %115 = arith.truncf %107 : vector<32x128xf32> to vector<32x128xbf16>
    %c1_62 = arith.constant 1 : index
    %c0_63 = arith.constant 0 : index
    %c0_64 = arith.constant 0 : index
    %116 = vector.load %arg10[%c1_62, %c0_63, %c0_64] : memref<3x128x128xbf16, #tpu.memory_space<vmem>>, vector<1x128x128xbf16>
    %117 = vector.shape_cast %116 : vector<1x128x128xbf16> to vector<128x128xbf16>
    %cst_65 = arith.constant dense<0.000000e+00> : vector<32x128xf32>
    %118 = tpu.matmul %115, %117, %cst_65 {dimension_numbers = #tpu.dot_dimension_numbers<[1], [0], [0], [1], [0, 0, 1, 1], [], []>} : vector<32x128xbf16>, vector<128x128xbf16>, vector<32x128xf32> -> vector<32x128xf32>
    %119 = arith.addf %114, %118 : vector<32x128xf32>
    %c31_i32_66 = arith.constant 31 : i32
    %120 = tpu.dynamic_rotate %107 by %c31_i32_66 dim 0 : vector<32x128xf32>, i32 -> vector<32x128xf32>
    %121 = vector.broadcast %25 : vector<32x1xf32> to vector<32x128xf32>
    %122 = arith.mulf %120, %121 : vector<32x128xf32>
    %123 = arith.truncf %122 : vector<32x128xf32> to vector<32x128xbf16>
    %c2_67 = arith.constant 2 : index
    %c0_68 = arith.constant 0 : index
    %c0_69 = arith.constant 0 : index
    %124 = vector.load %arg10[%c2_67, %c0_68, %c0_69] : memref<3x128x128xbf16, #tpu.memory_space<vmem>>, vector<1x128x128xbf16>
    %125 = vector.shape_cast %124 : vector<1x128x128xbf16> to vector<128x128xbf16>
    %cst_70 = arith.constant dense<0.000000e+00> : vector<32x128xf32>
    %126 = tpu.matmul %123, %125, %cst_70 {dimension_numbers = #tpu.dot_dimension_numbers<[1], [0], [0], [1], [0, 0, 1, 1], [], []>} : vector<32x128xbf16>, vector<128x128xbf16>, vector<32x128xf32> -> vector<32x128xf32>
    %127 = arith.addf %119, %126 : vector<32x128xf32>
    %c0_71 = arith.constant 0 : index
    %c0_72 = arith.constant 0 : index
    %128 = vector.load %arg11[%c0_71, %c0_72] : memref<1x128xf32, #tpu.memory_space<vmem>>, vector<1x128xf32>
    %129 = vector.broadcast %128 : vector<1x128xf32> to vector<32x128xf32>
    %130 = arith.addf %127, %129 : vector<32x128xf32>
    %131 = arith.addf %130, %82 : vector<32x128xf32>
    %cst_73 = arith.constant 0.000000e+00 : f32
    %132 = vector.broadcast %cst_73 : f32 to vector<32x128xf32>
    %133 = arith.maximumf %131, %132 : vector<32x128xf32>
    %134 = arith.truncf %82 : vector<32x128xf32> to vector<32x128xbf16>
    %c0_74 = arith.constant 0 : index
    %c0_75 = arith.constant 0 : index
    %c0_76 = arith.constant 0 : index
    %135 = vector.load %arg12[%c0_74, %c0_75, %c0_76] : memref<2x128x128xbf16, #tpu.memory_space<vmem>>, vector<1x128x128xbf16>
    %136 = vector.shape_cast %135 : vector<1x128x128xbf16> to vector<128x128xbf16>
    %cst_77 = arith.constant dense<0.000000e+00> : vector<32x128xf32>
    %137 = tpu.matmul %134, %136, %cst_77 {dimension_numbers = #tpu.dot_dimension_numbers<[1], [0], [0], [1], [0, 0, 1, 1], [], []>} : vector<32x128xbf16>, vector<128x128xbf16>, vector<32x128xf32> -> vector<32x128xf32>
    %138 = arith.truncf %133 : vector<32x128xf32> to vector<32x128xbf16>
    %c1_78 = arith.constant 1 : index
    %c0_79 = arith.constant 0 : index
    %c0_80 = arith.constant 0 : index
    %139 = vector.load %arg12[%c1_78, %c0_79, %c0_80] : memref<2x128x128xbf16, #tpu.memory_space<vmem>>, vector<1x128x128xbf16>
    %140 = vector.shape_cast %139 : vector<1x128x128xbf16> to vector<128x128xbf16>
    %cst_81 = arith.constant dense<0.000000e+00> : vector<32x128xf32>
    %141 = tpu.matmul %138, %140, %cst_81 {dimension_numbers = #tpu.dot_dimension_numbers<[1], [0], [0], [1], [0, 0, 1, 1], [], []>} : vector<32x128xbf16>, vector<128x128xbf16>, vector<32x128xf32> -> vector<32x128xf32>
    %142 = arith.addf %137, %141 : vector<32x128xf32>
    %c0_82 = arith.constant 0 : index
    %c0_83 = arith.constant 0 : index
    %143 = vector.load %arg13[%c0_82, %c0_83] : memref<1x128xf32, #tpu.memory_space<vmem>>, vector<1x128xf32>
    %144 = vector.broadcast %143 : vector<1x128xf32> to vector<32x128xf32>
    %145 = arith.addf %142, %144 : vector<32x128xf32>
    %cst_84 = arith.constant 0.000000e+00 : f32
    %146 = vector.broadcast %cst_84 : f32 to vector<32x128xf32>
    %147 = arith.maximumf %145, %146 : vector<32x128xf32>
    %c0_85 = arith.constant 0 : index
    %c0_86 = arith.constant 0 : index
    %148 = vector.load %arg14[%c0_85, %c0_86] : memref<32x128xf32, #tpu.memory_space<vmem>>, vector<32x128xf32>
    tpu.vector_store %arg14[%c0_85, %c0_86], %147 {strides = array<i32>} : memref<32x128xf32, #tpu.memory_space<vmem>>, vector<32x128xf32>,
    return
  }
  func.func @transform_0(%arg0: i32) -> (i32, i32) {
    %c0_i32 = arith.constant 0 : i32
    %c0_i32_0 = arith.constant 0 : i32
    return %arg0, %c0_i32 : i32, i32
  }
  func.func @transform_1(%arg0: i32) -> (i32, i32, i32) {
    %c0_i32 = arith.constant 0 : i32
    %c0_i32_0 = arith.constant 0 : i32
    %c0_i32_1 = arith.constant 0 : i32
    %c0_i32_2 = arith.constant 0 : i32
    return %c0_i32, %c0_i32_0, %c0_i32_1 : i32, i32, i32
  }
  func.func @transform_2(%arg0: i32) -> (i32, i32) {
    %c0_i32 = arith.constant 0 : i32
    %c0_i32_0 = arith.constant 0 : i32
    %c0_i32_1 = arith.constant 0 : i32
    return %c0_i32, %c0_i32_0 : i32, i32
  }
  func.func @transform_3(%arg0: i32) -> (i32, i32) {
    %c0_i32 = arith.constant 0 : i32
    %c0_i32_0 = arith.constant 0 : i32
    %c0_i32_1 = arith.constant 0 : i32
    return %c0_i32, %c0_i32_0 : i32, i32
  }
  func.func @transform_4(%arg0: i32) -> (i32, i32) {
    %c0_i32 = arith.constant 0 : i32
    %c0_i32_0 = arith.constant 0 : i32
    %c0_i32_1 = arith.constant 0 : i32
    return %c0_i32, %c0_i32_0 : i32, i32
  }
  func.func @transform_5(%arg0: i32) -> (i32, i32, i32) {
    %c0_i32 = arith.constant 0 : i32
    %c0_i32_0 = arith.constant 0 : i32
    %c0_i32_1 = arith.constant 0 : i32
    %c0_i32_2 = arith.constant 0 : i32
    return %c0_i32, %c0_i32_0, %c0_i32_1 : i32, i32, i32
  }
  func.func @transform_6(%arg0: i32) -> (i32, i32) {
    %c0_i32 = arith.constant 0 : i32
    %c0_i32_0 = arith.constant 0 : i32
    %c0_i32_1 = arith.constant 0 : i32
    return %c0_i32, %c0_i32_0 : i32, i32
  }
  func.func @transform_7(%arg0: i32) -> (i32, i32, i32) {
    %c0_i32 = arith.constant 0 : i32
    %c0_i32_0 = arith.constant 0 : i32
    %c0_i32_1 = arith.constant 0 : i32
    %c0_i32_2 = arith.constant 0 : i32
    return %c0_i32, %c0_i32_0, %c0_i32_1 : i32, i32, i32
  }
  func.func @transform_8(%arg0: i32) -> (i32, i32) {
    %c0_i32 = arith.constant 0 : i32
    %c0_i32_0 = arith.constant 0 : i32
    %c0_i32_1 = arith.constant 0 : i32
    return %c0_i32, %c0_i32_0 : i32, i32
  }
  func.func @transform_9(%arg0: i32) -> (i32, i32, i32) {
    %c0_i32 = arith.constant 0 : i32
    %c0_i32_0 = arith.constant 0 : i32
    %c0_i32_1 = arith.constant 0 : i32
    %c0_i32_2 = arith.constant 0 : i32
    return %c0_i32, %c0_i32_0, %c0_i32_1 : i32, i32, i32
  }
  func.func @transform_10(%arg0: i32) -> (i32, i32) {
    %c0_i32 = arith.constant 0 : i32
    %c0_i32_0 = arith.constant 0 : i32
    %c0_i32_1 = arith.constant 0 : i32
    return %c0_i32, %c0_i32_0 : i32, i32
  }
  func.func @transform_11(%arg0: i32) -> (i32, i32, i32) {
    %c0_i32 = arith.constant 0 : i32
    %c0_i32_0 = arith.constant 0 : i32
    %c0_i32_1 = arith.constant 0 : i32
    %c0_i32_2 = arith.constant 0 : i32
    return %c0_i32, %c0_i32_0, %c0_i32_1 : i32, i32, i32
  }
  func.func @transform_12(%arg0: i32) -> (i32, i32) {
    %c0_i32 = arith.constant 0 : i32
    %c0_i32_0 = arith.constant 0 : i32
    %c0_i32_1 = arith.constant 0 : i32
    return %c0_i32, %c0_i32_0 : i32, i32
  }
  func.func @transform_13(%arg0: i32) -> (i32, i32) {
    %c0_i32 = arith.constant 0 : i32
    %c0_i32_0 = arith.constant 0 : i32
    return %arg0, %c0_i32 : i32, i32
  }
}

</mosaic_0001>

<bundles_post_ra>
// kernel: tree_forward.1
= control target key start
LH: loop header
LB: loop body
LE: loop exit
PB: predicated region body
PF: predicated region fallthrough
CT: control target
= control target key end

     0   :  { %v49_v0 = vlaneseq  ;;  %vm184_vm0 = vcmask 523264   ;;  %v2764_v14 = vmov 0.0   ;;  %s3355_s1 = inlined_call_operand.vmem [shape: bf16[3,64,128], index: 1, kind: input, shape index: {}]   ;;  %s3356_s0 = inlined_call_operand.vmem [shape: f32[32,64], index: 0, kind: input, shape index: {}]   ;;  %s3357_s3 = inlined_call_operand.vmem [shape: bf16[64,128], index: 3, kind: input, shape index: {}]   ;;  %s3358_s5 = inlined_call_operand.vmem [shape: bf16[3,128,128], index: 5, kind: input, shape index: {}]   ;;  %s3359_s7 = inlined_call_operand.vmem [shape: bf16[3,128,128], index: 7, kind: input, shape index: {}]   ;;  %s3360_s2 = inlined_call_operand.vmem [shape: f32[1,128], index: 2, kind: input, shape index: {}]   ;;  %s3361_s9 = inlined_call_operand.vmem [shape: bf16[3,128,128], index: 9, kind: input, shape index: {}]   ;;  %s3362_s4 = inlined_call_operand.vmem [shape: f32[1,128], index: 4, kind: input, shape index: {}]   ;;  %s3363_s6 = inlined_call_operand.vmem [shape: f32[1,128], index: 6, kind: input, shape index: {}]   ;;  %s3364_s11 = inlined_call_operand.vmem [shape: bf16[2,128,128], index: 11, kind: input, shape index: {}]   ;;  %s3365_s8 = inlined_call_operand.vmem [shape: f32[1,128], index: 8, kind: input, shape index: {}]   ;;  %s3366_s10 = inlined_call_operand.vmem [shape: f32[1,128], index: 10, kind: input, shape index: {}]   ;;  %s3367_s12 = inlined_call_operand.vmem [shape: f32[1,128], index: 12, kind: input, shape index: {}]   ;;  %s3368_s13 = inlined_call_operand.vmem [shape: f32[32,128], index: 13, kind: output, shape index: {}]  }
   0x1   :  { %v2660_v1 = vld [vmem:[%s3355_s1 + $0x20] sm:$0xff]   ;;  %v2661_v2 = vld [vmem:[%s3355_s1 + $0x28] sm:$0xff]   ;;  %v2662_v4 = vld [vmem:[%s3355_s1 + $0x30] sm:$0xff]  }
   0x2   :  { %v2841_v3 = vshrl.u32 %v49_v0, 7  ;;  %2343 = vmatprep.subr.bf16.mxu0 %v2660_v1  ;;  %v2850_v6 = vld [vmem:[%s3356_s0] sm:$0xff]  ;;  %v2855_v7 = vld [vmem:[%s3356_s0 + $0x8] sm:$0xff]  ;;  %v2863_v10 = vld [vmem:[%s3356_s0 + $0x18] sm:$0xff] }
   0x3   :  { %2344 = vmatpush3.bf16.msra.mxu0 %v2660_v1  ;;  %v126_v8 = vrot.slane %v2850_v6, 7  ;;  %v149_v9 = vpack.c.bf16 %v2855_v7, %v2850_v6  ;;  %v129_v11 = vrot.slane %v2863_v10, 7  ;;  %v2663_v12 = vld [vmem:[%s3355_s1 + $0x38] sm:$0xff]   ;;  %v127_v13 = vrot.slane %v2855_v7, 7  ;;  %v2881_v17 = vld [vmem:[%s3356_s0 + $0x10] sm:$0xff]  ;;  %v2664_v19 = vld [vmem:[%s3355_s1] sm:$0xff]  }
   0x4   :  { %v58_v5 = vand.u32 15, %v2841_v3  ;;  %2345 = vmatprep.subr.bf16.mxu0 %v2661_v2  ;;  %vm130_vm2 = vcmp.lt.s32.totalorder %v2841_v3, 1  ;;  %v52_v21 = vadd.s32 16, %v2841_v3  ;;  %v51_v22 = vadd.s32 8, %v2841_v3  ;;  %v2665_v24 = vld [vmem:[%s3355_s1 + $0x8] sm:$0xff]   ;;  %v2672_v26 = vld [vmem:[%s3357_s3] sm:$0xff]  }
   0x5   :  { %2351 = vmatprep.mubr.msk.bf16.mxu0 %vm184_vm0, %v149_v9  ;;  %2387 = vmatprep.mubr.msk.bf16.mxu1 %vm184_vm0, %v149_v9  ;;  %v134_v16 = vsel %vm130_vm2, %v129_v11, %v126_v8  ;;  %v133_v20 = vsel %vm130_vm2, %v126_v8, %v127_v13  ;;  %v150_v23 = vpack.c.bf16 %v2863_v10, %v2881_v17  ;;  %vm323_vm3 = vcmp.lt.s32.totalorder %v2841_v3, 7  ;;  %v2673_v28 = vld [vmem:[%s3357_s3 + $0x8] sm:$0xff]   ;;  %v2666_v32 = vld [vmem:[%s3355_s1 + $0x10] sm:$0xff]   ;;  %v2667_v38 = vld [vmem:[%s3355_s1 + $0x18] sm:$0xff]  }
   0x6   :  { %vm102_vm1 = vcmp.ne.s32.totalorder %v58_v5, 0  ;;  %v72_v27 = vand.u32 15, %v52_v21  ;;  %v320_v29 = vrot.slane %v2855_v7, 1  ;;  %v65_v30 = vand.u32 15, %v51_v22  ;;  %2379 = vmatprep.subr.bf16.mxu1 %v2672_v26  ;;  %v2674_v34 = vld [vmem:[%s3357_s3 + $0x10] sm:$0xff]   ;;  %v2675_v41 = vld [vmem:[%s3357_s3 + $0x18] sm:$0xff]  }
   0x7   :  { %2346 = vmatpush3.bf16.msra.mxu0 %v2661_v2  ;;  %v2874_v15 = vsel %vm102_vm1, 1.0, %v2764_v14  ;;  %v128_v31 = vrot.slane %v2881_v17, 7  ;;  %2380 = vmatpush3.bf16.msra.mxu1 %v2672_v26  ;;  %v321_v33 = vrot.slane %v2881_v17, 1  ;;  %v53_v35 = vadd.s32 24, %v2841_v3  ;;  %v2676_v45 = vld [vmem:[%s3358_s5 + $0x40] sm:$0xff]   ;;  %v2669_v52 = vld [vmem:[%s3355_s1 + $0x48] sm:$0xff]  }
   0x8   :  { %2347 = vmatprep.subr.bf16.mxu0 %v2662_v4  ;;  %v135_v18 = vmul.f32 %v2874_v15, %v134_v16  ;;  %vm104_vm4 = vcmp.ne.s32.totalorder %v72_v27, 0  ;;  %2381 = vmatprep.subr.bf16.mxu1 %v2673_v28  ;;  %v319_v36 = vrot.slane %v2850_v6, 1  ;;  %vm115_vm5 = vcmp.ne.s32.totalorder %v65_v30, 15  ;;  %v2668_v46 = vld [vmem:[%s3355_s1 + $0x40] sm:$0xff]   ;;  %v2677_v53 = vld [vmem:[%s3358_s5 + $0x48] sm:$0xff]   ;;  %v2678_v55 = vld [vmem:[%s3358_s5 + $0x50] sm:$0xff]  }
   0x9   :  { %v322_v37 = vrot.slane %v2863_v10, 1  ;;  %v2921_v39 = vsel %vm104_vm4, 1.0, %v2764_v14  ;;  %v132_v40 = vsel %vm130_vm2, %v127_v13, %v128_v31  ;;  %v2929_v42 = vsel %vm115_vm5, 1.0, %v2764_v14  ;;  %v2670_v56 = vld [vmem:[%s3355_s1 + $0x50] sm:$0xff]   ;;  %v2679_v59 = vld [vmem:[%s3358_s5 + $0x58] sm:$0xff]   ;;  %v2680_v63 = vld [vmem:[%s3358_s5 + $0x60] sm:$0xff]  }
   0xa   :  { %v139_v25 = vpack.c.bf16 %v133_v20, %v135_v18  ;;  %v325_v43 = vsel %vm323_vm3, %v320_v29, %v321_v33  ;;  %v79_v44 = vand.u32 15, %v53_v35  ;;  %v137_v47 = vmul.f32 %v2921_v39, %v132_v40  ;;  %v2671_v60 = vld [vmem:[%s3355_s1 + $0x58] sm:$0xff]   ;;  %v2681_v1 = vld [vmem:[%s3358_s5 + $0x68] sm:$0xff]   ;;  %v2682_v2 = vld [vmem:[%s3358_s5 + $0x70] sm:$0xff]  }
   0xb   :  { %2348 = vmatpush3.bf16.msra.mxu0 %v2662_v4  ;;  %2382 = vmatpush3.bf16.msra.mxu1 %v2673_v28  ;;  %v131_v48 = vsel %vm130_vm2, %v128_v31, %v129_v11  ;;  %v329_v49 = vmul.f32 %v2929_v42, %v325_v43  ;;  %v326_v50 = vsel %vm323_vm3, %v319_v36, %v320_v29  ;;  %v2683_v4 = vld [vmem:[%s3358_s5 + $0x78] sm:$0xff]   ;;  %v2684_v5 = vld [vmem:[%s3358_s5] sm:$0xff]   ;;  %v2701_v7 = vld [vmem:[%s3359_s7 + $0x48] sm:$0xff]  }
   0xc   :  { %2349 = vmatprep.subr.bf16.mxu0 %v2663_v12  ;;  %2383 = vmatprep.subr.bf16.mxu1 %v2674_v34  ;;  %v140_v51 = vpack.c.bf16 %v131_v48, %v137_v47  ;;  %vm117_vm6 = vcmp.ne.s32.totalorder %v79_v44, 15  ;;  %v327_v58 = vsel %vm323_vm3, %v322_v37, %v319_v36  ;;  %v324_v62 = vsel %vm323_vm3, %v321_v33, %v322_v37  ;;  %v2700_v6 = vld [vmem:[%s3359_s7 + $0x40] sm:$0xff]   ;;  %v2702_v8 = vld [vmem:[%s3359_s7 + $0x50] sm:$0xff]   ;;  %v2703_v9 = vld [vmem:[%s3359_s7 + $0x58] sm:$0xff]  }
   0xd   :  { %v332_v54 = vpack.c.bf16 %v329_v49, %v326_v50  ;;  %v2961_v57 = vsel %vm117_vm6, 1.0, %v2764_v14  ;;  %v2704_v10 = vld [vmem:[%s3359_s7 + $0x60] sm:$0xff]   ;;  %v2685_v36 = vld [vmem:[%s3358_s5 + $0x8] sm:$0xff]   ;;  %v2735_v3 = vld [vmem:[%s3361_s9 + $0x18] sm:$0xff]  }
   0xe   :  { %v331_v61 = vmul.f32 %v2961_v57, %v327_v58  ;;  %v1997_v11 = vld [vmem:[%s3360_s2] ss:$0 sm:$0xff]  ;;  %v2689_v58 = vld [vmem:[%s3358_s5 + $0x28] sm:$0xff]  }
   0xf   :  { %2350 = vmatpush3.bf16.msra.mxu0 %v2663_v12  ;;  %2384 = vmatpush3.bf16.msra.mxu1 %v2674_v34 }
  0x10   :  { %2355 = vmatprep.subr.bf16.mxu0 %v2664_v19  ;;  %2385 = vmatprep.subr.bf16.mxu1 %v2675_v41  ;;  %v333_v0 = vpack.c.bf16 %v331_v61, %v324_v62  ;;  %v2692_v61 = vld [vmem:[%s3358_s5 + $0x80] sm:$0xff]   ;;  %v2693_v62 = vld [vmem:[%s3358_s5 + $0x88] sm:$0xff]  }
  0x12   :  { %2352 = vmatmul.mubr.msk.bf16.vlgmr.msra.gmra.mrb[0].mxu0 %vm184_vm0, %v150_v23 }
  0x13   :  { %2356 = vmatpush3.bf16.msra.mxu0 %v2664_v19  ;;  %2363 = vmatprep.mubr.msk.bf16.mxu0 %vm184_vm0, %v139_v25 }
  0x14   :  { %2357 = vmatprep.subr.bf16.mxu0 %v2665_v24  ;;  %2386 = vmatpush3.bf16.msra.mxu1 %v2675_v41 }
  0x15   :  { %2391 = vmatprep.subr.bf16.mxu1 %v2676_v45 }
  0x17   :  { %2358 = vmatpush3.bf16.msra.mxu0 %v2665_v24  ;;  %2388 = vmatmul.mubr.msk.bf16.vlgmr.msra.gmra.mrb[0].mxu1 %vm184_vm0, %v150_v23 }
  0x18   :  { %2359 = vmatprep.subr.bf16.mxu0 %v2666_v32  ;;  %2392 = vmatpush3.bf16.msra.mxu1 %v2676_v45 }
  0x19   :  { %2393 = vmatprep.subr.bf16.mxu1 %v2677_v53 }
  0x1b   :  { %2360 = vmatpush3.bf16.msra.mxu0 %v2666_v32 }
  0x1c   :  { %2361 = vmatprep.subr.bf16.mxu0 %v2667_v38  ;;  %2394 = vmatpush3.bf16.msra.mxu1 %v2677_v53 }
  0x1d   :  { %2395 = vmatprep.subr.bf16.mxu1 %v2678_v55 }
  0x1f   :  { %2362 = vmatpush3.bf16.msra.mxu0 %v2667_v38 }
  0x20   :  { %2367 = vmatprep.subr.bf16.mxu0 %v2668_v46  ;;  %2396 = vmatpush3.bf16.msra.mxu1 %v2678_v55  ;;  %v2687_v55 = vld [vmem:[%s3358_s5 + $0x18] sm:$0xff]  }
  0x21   :  { %2397 = vmatprep.subr.bf16.mxu1 %v2679_v59 }
  0x22   :  { %2364 = vmatmul.mubr.msk.bf16.vlgmr.msra.gmra.mrb[0].mxu0 %vm184_vm0, %v140_v51  ;;  %v2686_v51 = vld [vmem:[%s3358_s5 + $0x10] sm:$0xff]  }
  0x23   :  { %2368 = vmatpush3.bf16.msra.mxu0 %v2668_v46  ;;  %2375 = vmatprep.mubr.msk.bf16.mxu0 %vm184_vm0, %v332_v54 }
  0x24   :  { %2369 = vmatprep.subr.bf16.mxu0 %v2669_v52  ;;  %2398 = vmatpush3.bf16.msra.mxu1 %v2679_v59  ;;  %v2690_v59 = vld [vmem:[%s3358_s5 + $0x30] sm:$0xff]  }
  0x25   :  { %2399 = vmatprep.subr.bf16.mxu1 %v2680_v63 }
  0x27   :  { %2370 = vmatpush3.bf16.msra.mxu0 %v2669_v52 }
  0x28   :  { %2371 = vmatprep.subr.bf16.mxu0 %v2670_v56  ;;  %2400 = vmatpush3.bf16.msra.mxu1 %v2680_v63  ;;  %v2694_v63 = vld [vmem:[%s3358_s5 + $0x90] sm:$0xff]  }
  0x29   :  { %2401 = vmatprep.subr.bf16.mxu1 %v2681_v1 }
  0x2b   :  { %2372 = vmatpush3.bf16.msra.mxu0 %v2670_v56  ;;  %v2688_v56 = vld [vmem:[%s3358_s5 + $0x20] sm:$0xff]  }
  0x2c   :  { %2373 = vmatprep.subr.bf16.mxu0 %v2671_v60  ;;  %2402 = vmatpush3.bf16.msra.mxu1 %v2681_v1  ;;  %v2696_v1 = vld [vmem:[%s3358_s5 + $0xa0] sm:$0xff]  }
  0x2d   :  { %2403 = vmatprep.subr.bf16.mxu1 %v2682_v2 }
  0x2f   :  { %2374 = vmatpush3.bf16.msra.mxu0 %v2671_v60  ;;  %v2691_v60 = vld [vmem:[%s3358_s5 + $0x38] sm:$0xff]  }
  0x30   :  { %2404 = vmatpush3.bf16.msra.mxu1 %v2682_v2  ;;  %2451 = vmatprep.subr.bf16.mxu0 %v2700_v6  ;;  %v2697_v2 = vld [vmem:[%s3358_s5 + $0xa8] sm:$0xff]  }
  0x31   :  { %2405 = vmatprep.subr.bf16.mxu1 %v2683_v4 }
  0x32   :  { %2376 = vmatmul.mubr.msk.bf16.vlgmr.msra.gmra.mrb[0].mxu0 %vm184_vm0, %v333_v0  ;;  %v2695_v0 = vld [vmem:[%s3358_s5 + $0x98] sm:$0xff]  }
  0x33   :  { %2452 = vmatpush3.bf16.msra.mxu0 %v2700_v6  ;;  %v2705_v6 = vld [vmem:[%s3359_s7 + $0x68] sm:$0xff]  }
  0x34   :  { %2406 = vmatpush3.bf16.msra.mxu1 %v2683_v4  ;;  %2453 = vmatprep.subr.bf16.mxu0 %v2701_v7  ;;  %v2698_v4 = vld [vmem:[%s3358_s5 + $0xb0] sm:$0xff]  }
  0x35   :  { %2411 = vmatprep.subr.bf16.mxu1 %v2684_v5 }
  0x37   :  { %2454 = vmatpush3.bf16.msra.mxu0 %v2701_v7  ;;  %v2706_v7 = vld [vmem:[%s3359_s7 + $0x70] sm:$0xff]  }
  0x38   :  { %2455 = vmatprep.subr.bf16.mxu0 %v2702_v8 }
  0x3b   :  { %2456 = vmatpush3.bf16.msra.mxu0 %v2702_v8  ;;  %v2707_v8 = vld [vmem:[%s3359_s7 + $0x78] sm:$0xff]  }
  0x3c   :  { %2457 = vmatprep.subr.bf16.mxu0 %v2703_v9 }
  0x3f   :  { %2458 = vmatpush3.bf16.msra.mxu0 %v2703_v9  ;;  %v2708_v9 = vld [vmem:[%s3359_s7] sm:$0xff]  }
  0x40   :  { %2459 = vmatprep.subr.bf16.mxu0 %v2704_v10 }
  0x43   :  { %2460 = vmatpush3.bf16.msra.mxu0 %v2704_v10  ;;  %v2724_v10 = vld [vmem:[%s3361_s9 + $0x40] sm:$0xff]  }
  0x44   :  { %2461 = vmatprep.subr.bf16.mxu0 %v2705_v6 }
  0x47   :  { %2462 = vmatpush3.bf16.msra.mxu0 %v2705_v6  ;;  %v2719_v6 = vld [vmem:[%s3359_s7 + $0x98] sm:$0xff]  }
  0x48   :  { %2463 = vmatprep.subr.bf16.mxu0 %v2706_v7 }
  0x4b   :  { %2464 = vmatpush3.bf16.msra.mxu0 %v2706_v7  ;;  %v2720_v7 = vld [vmem:[%s3359_s7 + $0xa0] sm:$0xff]  }
  0x4c   :  { %2465 = vmatprep.subr.bf16.mxu0 %v2707_v8 }
  0x4f   :  { %2466 = vmatpush3.bf16.msra.mxu0 %v2707_v8  ;;  %v2721_v8 = vld [vmem:[%s3359_s7 + $0xa8] sm:$0xff]  }
  0x50   :  { %2471 = vmatprep.subr.bf16.mxu0 %v2708_v9 }
 0x105   :  { %v2377_v12 = vpop.f32.mrb[0].mxu0 }
 0x106   :  { %v435_v13 = vadd.f32 %v2377_v12, %v1997_v11  ;;  %v407_v14 = vpop.f32.mrb[1].mxu0  ;;  %v2726_v12 = vld [vmem:[%s3361_s9 + $0x50] sm:$0xff]  }
 0x107   :  { %v433_v16 = vadd.f32 %v1997_v11, %v407_v14  ;;  %v2378_v17 = vpop.f32.mrb[2].mxu0  ;;  %v2728_v14 = vld [vmem:[%s3361_s9 + $0x60] sm:$0xff]  }
 0x108   :  { %v439_v18 = vmax.f32 %v435_v13, 0.0  ;;  %v436_v19 = vadd.f32 %v2378_v17, %v1997_v11  ;;  %v410_v20 = vpop.f32.mrb[3].mxu0  ;;  %v2727_v13 = vld [vmem:[%s3361_s9 + $0x58] sm:$0xff]   ;;  %v1998_v17 = vld [vmem:[%s3362_s4] ss:$0 sm:$0xff] }
 0x109   :  { %v437_v21 = vmax.f32 %v433_v16, 0.0  ;;  %v434_v22 = vadd.f32 %v1997_v11, %v410_v20  ;;  %v2725_v11 = vld [vmem:[%s3361_s9 + $0x48] sm:$0xff]  }
 0x10a   :  { %v440_v23 = vmax.f32 %v436_v19, 0.0  ;;  %v531_v24 = vrot.slane %v439_v18, 7  ;;  %v774_v28 = vrot.slane %v439_v18, 1  ;;  %v2729_v16 = vld [vmem:[%s3361_s9 + $0x68] sm:$0xff]   ;;  %v2061_v19 = vld [vmem:[%s3363_s6] ss:$0 sm:$0xff] }
 0x10b   :  { %v529_v25 = vrot.slane %v437_v21, 7  ;;  %v772_v26 = vrot.slane %v437_v21, 1  ;;  %v438_v27 = vmax.f32 %v434_v22, 0.0 }
 0x10c   :  { %v532_v29 = vrot.slane %v440_v23, 7  ;;  %v560_v30 = vpack.c.bf16 %v440_v23, %v439_v18  ;;  %v775_v31 = vrot.slane %v440_v23, 1 }
 0x10d   :  { %v530_v32 = vrot.slane %v438_v27, 7  ;;  %v773_v33 = vrot.slane %v438_v27, 1  ;;  %v559_v34 = vpack.c.bf16 %v438_v27, %v437_v21 }
 0x10e   :  { %v779_v35 = vsel %vm323_vm3, %v775_v31, %v772_v26  ;;  %v536_v37 = vsel %vm130_vm2, %v532_v29, %v529_v25  ;;  %v533_v38 = vsel %vm130_vm2, %v531_v24, %v532_v29  ;;  %v3019_v40 = vsel %vm323_vm3, %v774_v28, %v775_v31 }
 0x10f   :  { %v534_v41 = vsel %vm130_vm2, %v530_v32, %v531_v24  ;;  %2407 = vmatprep.mubr.bf16.mxu1 %v559_v34  ;;  %v535_v43 = vsel %vm130_vm2, %v529_v25, %v530_v32  ;;  %v537_v44 = vmul.f32 %v2874_v15, %v536_v37  ;;  %v777_v45 = vsel %vm323_vm3, %v773_v33, %v774_v28 }
 0x110   :  { %2408 = vmatmul.mubr.bf16.vlgmr.msra.gmra.mrb[0].mxu1 %v560_v30  ;;  %v539_v46 = vmul.f32 %v2921_v39, %v534_v41  ;;  %v778_v47 = vsel %vm323_vm3, %v772_v26, %v773_v33  ;;  %v781_v48 = vmul.f32 %v2929_v42, %v777_v45  ;;  %v783_v49 = vmul.f32 %v2961_v57, %v779_v35  ;;  %v2709_v41 = vld [vmem:[%s3359_s7 + $0x8] sm:$0xff]  }
 0x111   :  { %2412 = vmatpush3.bf16.msra.mxu1 %v2684_v5  ;;  %v541_v50 = vpack.c.bf16 %v535_v43, %v537_v44  ;;  %v2699_v5 = vld [vmem:[%s3358_s5 + $0xb8] sm:$0xff]  }
 0x112   :  { %2413 = vmatprep.subr.bf16.mxu1 %v2685_v36  ;;  %v542_v52 = vpack.c.bf16 %v533_v38, %v539_v46  ;;  %v784_v53 = vpack.c.bf16 %v781_v48, %v778_v47  ;;  %v785_v54 = vpack.c.bf16 %v783_v49, %v3019_v40  ;;  %v2710_v47 = vld [vmem:[%s3359_s7 + $0x10] sm:$0xff]   ;;  %v2711_v48 = vld [vmem:[%s3359_s7 + $0x18] sm:$0xff]   ;;  %v2712_v49 = vld [vmem:[%s3359_s7 + $0x20] sm:$0xff]  }
 0x113   :  { %2427 = vmatprep.mubr.bf16.mxu1 %v541_v50  ;;  %v2713_v50 = vld [vmem:[%s3359_s7 + $0x28] sm:$0xff]  }
 0x115   :  { %2414 = vmatpush3.bf16.msra.mxu1 %v2685_v36 }
 0x116   :  { %2415 = vmatprep.subr.bf16.mxu1 %v2686_v51 }
 0x119   :  { %2416 = vmatpush3.bf16.msra.mxu1 %v2686_v51  ;;  %v2714_v51 = vld [vmem:[%s3359_s7 + $0x30] sm:$0xff]  }
 0x11a   :  { %2417 = vmatprep.subr.bf16.mxu1 %v2687_v55 }
 0x11d   :  { %2418 = vmatpush3.bf16.msra.mxu1 %v2687_v55  ;;  %v2715_v55 = vld [vmem:[%s3359_s7 + $0x38] sm:$0xff]  }
 0x11e   :  { %2419 = vmatprep.subr.bf16.mxu1 %v2688_v56 }
 0x121   :  { %2420 = vmatpush3.bf16.msra.mxu1 %v2688_v56 }
 0x122   :  { %2421 = vmatprep.subr.bf16.mxu1 %v2689_v58 }
 0x125   :  { %2422 = vmatpush3.bf16.msra.mxu1 %v2689_v58 }
 0x126   :  { %2423 = vmatprep.subr.bf16.mxu1 %v2690_v59 }
 0x129   :  { %2424 = vmatpush3.bf16.msra.mxu1 %v2690_v59 }
 0x12a   :  { %2425 = vmatprep.subr.bf16.mxu1 %v2691_v60 }
 0x12d   :  { %2426 = vmatpush3.bf16.msra.mxu1 %v2691_v60  ;;  %v2716_v60 = vld [vmem:[%s3359_s7 + $0x80] sm:$0xff]  }
 0x12e   :  { %2431 = vmatprep.subr.bf16.mxu1 %v2692_v61 }
 0x130   :  { %2428 = vmatmul.mubr.bf16.vlgmr.msra.gmra.mrb[0].mxu1 %v542_v52 }
 0x131   :  { %2432 = vmatpush3.bf16.msra.mxu1 %v2692_v61  ;;  %2447 = vmatprep.mubr.bf16.mxu1 %v784_v53 }
 0x132   :  { %2433 = vmatprep.subr.bf16.mxu1 %v2693_v62 }
 0x135   :  { %2434 = vmatpush3.bf16.msra.mxu1 %v2693_v62 }
 0x136   :  { %2435 = vmatprep.subr.bf16.mxu1 %v2694_v63 }
 0x139   :  { %2436 = vmatpush3.bf16.msra.mxu1 %v2694_v63 }
 0x13a   :  { %2437 = vmatprep.subr.bf16.mxu1 %v2695_v0 }
 0x13d   :  { %2438 = vmatpush3.bf16.msra.mxu1 %v2695_v0 }
 0x13e   :  { %2439 = vmatprep.subr.bf16.mxu1 %v2696_v1 }
 0x141   :  { %2440 = vmatpush3.bf16.msra.mxu1 %v2696_v1 }
 0x142   :  { %2441 = vmatprep.subr.bf16.mxu1 %v2697_v2 }
 0x145   :  { %2442 = vmatpush3.bf16.msra.mxu1 %v2697_v2  ;;  %v2717_v2 = vld [vmem:[%s3359_s7 + $0x88] sm:$0xff]  }
 0x146   :  { %2443 = vmatprep.subr.bf16.mxu1 %v2698_v4 }
 0x149   :  { %2444 = vmatpush3.bf16.msra.mxu1 %v2698_v4 }
 0x14a   :  { %2445 = vmatprep.subr.bf16.mxu1 %v2699_v5 }
 0x14d   :  { %2446 = vmatpush3.bf16.msra.mxu1 %v2699_v5  ;;  %v2718_v5 = vld [vmem:[%s3359_s7 + $0x90] sm:$0xff]  }
 0x14e   :  { %2511 = vmatprep.subr.bf16.mxu1 %v2724_v10 }
 0x150   :  { %2448 = vmatmul.mubr.bf16.vlgmr.msra.gmra.mrb[0].mxu1 %v785_v54 }
 0x151   :  { %2512 = vmatpush3.bf16.msra.mxu1 %v2724_v10 }
 0x152   :  { %2513 = vmatprep.subr.bf16.mxu1 %v2725_v11 }
 0x155   :  { %2514 = vmatpush3.bf16.msra.mxu1 %v2725_v11  ;;  %v2723_v11 = vld [vmem:[%s3359_s7 + $0xb8] sm:$0xff]  }
 0x156   :  { %2515 = vmatprep.subr.bf16.mxu1 %v2726_v12 }
 0x159   :  { %2516 = vmatpush3.bf16.msra.mxu1 %v2726_v12 }
 0x15a   :  { %2517 = vmatprep.subr.bf16.mxu1 %v2727_v13 }
 0x15d   :  { %2518 = vmatpush3.bf16.msra.mxu1 %v2727_v13 }
 0x15e   :  { %2519 = vmatprep.subr.bf16.mxu1 %v2728_v14 }
 0x161   :  { %2520 = vmatpush3.bf16.msra.mxu1 %v2728_v14 }
 0x162   :  { %2521 = vmatprep.subr.bf16.mxu1 %v2729_v16 }
 0x165   :  { %2522 = vmatpush3.bf16.msra.mxu1 %v2729_v16 }
 0x223   :  { %v2449_v18 = vpop.f32.mrb[0].mxu1 }
 0x224   :  { %v2611_v20 = vadd.f32 %v2449_v18, %v1998_v17  ;;  %v885_v21 = vpop.f32.mrb[1].mxu1  ;;  %v2731_v18 = vld [vmem:[%s3361_s9 + $0x78] sm:$0xff]  }
 0x225   :  { %v2613_v22 = vadd.f32 %v1998_v17, %v885_v21  ;;  %v2450_v23 = vpop.f32.mrb[2].mxu1  ;;  %v2749_v21 = vld [vmem:[%s3364_s11 + $0x48] sm:$0xff]  }
 0x226   :  { %v2615_v24 = vadd.f32 %v2450_v23, %v1998_v17  ;;  %v888_v25 = vpop.f32.mrb[3].mxu1  ;;  %v2612_v28 = vadd.f32 %v2611_v20, %v2061_v19  ;;  %v2748_v20 = vld [vmem:[%s3364_s11 + $0x40] sm:$0xff]   ;;  %v2751_v23 = vld [vmem:[%s3364_s11 + $0x58] sm:$0xff]  }
 0x227   :  { %v2614_v26 = vadd.f32 %v2613_v22, %v2061_v19  ;;  %v2617_v27 = vadd.f32 %v1998_v17, %v888_v25  ;;  %v2730_v17 = vld [vmem:[%s3361_s9 + $0x70] sm:$0xff]   ;;  %v2118_v25 = vld [vmem:[%s3365_s8] ss:$0 sm:$0xff] }
 0x228   :  { %v2616_v29 = vadd.f32 %v2615_v24, %v2061_v19  ;;  %v3119_v35 = vmax.f32 %v2612_v28, 0.0  ;;  %2523 = vmatprep.subr.bf16.mxu1 %v2730_v17  ;;  %v2750_v22 = vld [vmem:[%s3364_s11 + $0x50] sm:$0xff]   ;;  %v2752_v24 = vld [vmem:[%s3364_s11 + $0x60] sm:$0xff]  }
 0x229   :  { %v3112_v30 = vmax.f32 %v2614_v26, 0.0  ;;  %v2618_v31 = vadd.f32 %v2617_v27, %v2061_v19  ;;  %2524 = vmatpush3.bf16.msra.mxu1 %v2730_v17  ;;  %v2732_v19 = vld [vmem:[%s3361_s9] sm:$0xff]  }
 0x22a   :  { %v3114_v32 = vmax.f32 %v2616_v29, 0.0  ;;  %v925_v53 = vrot.slane %v3119_v35, 7  ;;  %v1168_v54 = vrot.slane %v3119_v35, 1  ;;  %2525 = vmatprep.subr.bf16.mxu1 %v2731_v18  ;;  %v2744_v17 = vld [vmem:[%s3361_s9 + $0xa0] sm:$0xff]  }
 0x22b   :  { %v3116_v33 = vmax.f32 %v2618_v31, 0.0  ;;  %v923_v34 = vrot.slane %v3112_v30, 7  ;;  %v1166_v62 = vrot.slane %v3112_v30, 1 }
 0x22c   :  { %v926_v36 = vrot.slane %v3114_v32, 7  ;;  %v3129_v40 = vpack.c.bf16 %v3114_v32, %v3119_v35  ;;  %v1169_v10 = vrot.slane %v3114_v32, 1 }
 0x22d   :  { %v3124_v37 = vpack.c.bf16 %v3116_v33, %v3112_v30  ;;  %v924_v38 = vrot.slane %v3116_v33, 7  ;;  %v1167_v52 = vrot.slane %v3116_v33, 1  ;;  %2526 = vmatpush3.bf16.msra.mxu1 %v2731_v18  ;;  %v2745_v18 = vld [vmem:[%s3361_s9 + $0xa8] sm:$0xff]  }
 0x22e   :  { %v930_v43 = vsel %vm130_vm2, %v926_v36, %v923_v34  ;;  %v927_v63 = vsel %vm130_vm2, %v925_v53, %v926_v36  ;;  %v1173_v12 = vsel %vm323_vm3, %v1169_v10, %v1166_v62  ;;  %v1170_v14 = vsel %vm323_vm3, %v1168_v54, %v1169_v10  ;;  %2531 = vmatprep.subr.bf16.mxu1 %v2732_v19 }
 0x22f   :  { %2467 = vmatprep.mubr.bf16.mxu0 %v3124_v37  ;;  %v929_v44 = vsel %vm130_vm2, %v923_v34, %v924_v38  ;;  %v931_v45 = vmul.f32 %v2874_v15, %v930_v43  ;;  %v928_v56 = vsel %vm130_vm2, %v924_v38, %v925_v53  ;;  %v1171_v58 = vsel %vm323_vm3, %v1167_v52, %v1168_v54 }
 0x230   :  { %2468 = vmatmul.mubr.bf16.vlgmr.msra.gmra.mrb[4].mxu0 %v3129_v40  ;;  %v933_v59 = vmul.f32 %v2921_v39, %v928_v56  ;;  %v1175_v61 = vmul.f32 %v2929_v42, %v1171_v58  ;;  %v1172_v1 = vsel %vm323_vm3, %v1166_v62, %v1167_v52  ;;  %v1177_v13 = vmul.f32 %v2961_v57, %v1173_v12  ;;  %v2733_v58 = vld [vmem:[%s3361_s9 + $0x8] sm:$0xff]   ;;  %v2740_v12 = vld [vmem:[%s3361_s9 + $0x80] sm:$0xff]  }
 0x231   :  { %2472 = vmatpush3.bf16.msra.mxu0 %v2708_v9  ;;  %v935_v46 = vpack.c.bf16 %v929_v44, %v931_v45  ;;  %v2722_v9 = vld [vmem:[%s3359_s7 + $0xb0] sm:$0xff]  }
 0x232   :  { %2473 = vmatprep.subr.bf16.mxu0 %v2709_v41  ;;  %v936_v0 = vpack.c.bf16 %v927_v63, %v933_v59  ;;  %v1178_v4 = vpack.c.bf16 %v1175_v61, %v1172_v1  ;;  %v1179_v16 = vpack.c.bf16 %v1177_v13, %v1170_v14  ;;  %v2741_v13 = vld [vmem:[%s3361_s9 + $0x88] sm:$0xff]   ;;  %v2742_v14 = vld [vmem:[%s3361_s9 + $0x90] sm:$0xff]  }
 0x233   :  { %2487 = vmatprep.mubr.bf16.mxu0 %v935_v46 }
 0x235   :  { %2474 = vmatpush3.bf16.msra.mxu0 %v2709_v41 }
 0x236   :  { %2475 = vmatprep.subr.bf16.mxu0 %v2710_v47 }
 0x239   :  { %2476 = vmatpush3.bf16.msra.mxu0 %v2710_v47 }
 0x23a   :  { %2477 = vmatprep.subr.bf16.mxu0 %v2711_v48 }
 0x23d   :  { %2478 = vmatpush3.bf16.msra.mxu0 %v2711_v48 }
 0x23e   :  { %2479 = vmatprep.subr.bf16.mxu0 %v2712_v49 }
 0x241   :  { %2480 = vmatpush3.bf16.msra.mxu0 %v2712_v49 }
 0x242   :  { %2481 = vmatprep.subr.bf16.mxu0 %v2713_v50 }
 0x245   :  { %2482 = vmatpush3.bf16.msra.mxu0 %v2713_v50 }
 0x246   :  { %2483 = vmatprep.subr.bf16.mxu0 %v2714_v51 }
 0x249   :  { %2484 = vmatpush3.bf16.msra.mxu0 %v2714_v51 }
 0x24a   :  { %2485 = vmatprep.subr.bf16.mxu0 %v2715_v55 }
 0x24d   :  { %2486 = vmatpush3.bf16.msra.mxu0 %v2715_v55 }
 0x24e   :  { %2491 = vmatprep.subr.bf16.mxu0 %v2716_v60 }
 0x250   :  { %2488 = vmatmul.mubr.bf16.vlgmr.msra.gmra.mrb[4].mxu0 %v936_v0 }
 0x251   :  { %2492 = vmatpush3.bf16.msra.mxu0 %v2716_v60  ;;  %2507 = vmatprep.mubr.bf16.mxu0 %v1178_v4 }
 0x252   :  { %2493 = vmatprep.subr.bf16.mxu0 %v2717_v2 }
 0x255   :  { %2494 = vmatpush3.bf16.msra.mxu0 %v2717_v2 }
 0x256   :  { %2495 = vmatprep.subr.bf16.mxu0 %v2718_v5 }
 0x259   :  { %2496 = vmatpush3.bf16.msra.mxu0 %v2718_v5 }
 0x25a   :  { %2497 = vmatprep.subr.bf16.mxu0 %v2719_v6 }
 0x25d   :  { %2498 = vmatpush3.bf16.msra.mxu0 %v2719_v6 }
 0x25e   :  { %2499 = vmatprep.subr.bf16.mxu0 %v2720_v7 }
 0x261   :  { %2500 = vmatpush3.bf16.msra.mxu0 %v2720_v7 }
 0x262   :  { %2501 = vmatprep.subr.bf16.mxu0 %v2721_v8 }
 0x265   :  { %2502 = vmatpush3.bf16.msra.mxu0 %v2721_v8 }
 0x266   :  { %2503 = vmatprep.subr.bf16.mxu0 %v2722_v9 }
 0x269   :  { %2504 = vmatpush3.bf16.msra.mxu0 %v2722_v9 }
 0x26a   :  { %2505 = vmatprep.subr.bf16.mxu0 %v2723_v11 }
 0x26d   :  { %2506 = vmatpush3.bf16.msra.mxu0 %v2723_v11  ;;  %v2739_v11 = vld [vmem:[%s3361_s9 + $0x38] sm:$0xff]  }
 0x26e   :  { %2571 = vmatprep.subr.bf16.mxu0 %v2748_v20 }
 0x270   :  { %2508 = vmatmul.mubr.bf16.vlgmr.msra.gmra.mrb[4].mxu0 %v1179_v16  ;;  %v2743_v16 = vld [vmem:[%s3361_s9 + $0x98] sm:$0xff]  }
 0x271   :  { %2572 = vmatpush3.bf16.msra.mxu0 %v2748_v20  ;;  %v2747_v20 = vld [vmem:[%s3361_s9 + $0xb8] sm:$0xff]  }
 0x272   :  { %2573 = vmatprep.subr.bf16.mxu0 %v2749_v21 }
 0x275   :  { %2574 = vmatpush3.bf16.msra.mxu0 %v2749_v21  ;;  %v2753_v21 = vld [vmem:[%s3364_s11 + $0x68] sm:$0xff]  }
 0x276   :  { %2575 = vmatprep.subr.bf16.mxu0 %v2750_v22 }
 0x279   :  { %2576 = vmatpush3.bf16.msra.mxu0 %v2750_v22  ;;  %v2754_v22 = vld [vmem:[%s3364_s11 + $0x70] sm:$0xff]  }
 0x27a   :  { %2577 = vmatprep.subr.bf16.mxu0 %v2751_v23 }
 0x27d   :  { %2578 = vmatpush3.bf16.msra.mxu0 %v2751_v23  ;;  %v2755_v23 = vld [vmem:[%s3364_s11 + $0x78] sm:$0xff]  }
 0x27e   :  { %2579 = vmatprep.subr.bf16.mxu0 %v2752_v24 }
 0x281   :  { %2580 = vmatpush3.bf16.msra.mxu0 %v2752_v24  ;;  %v2756_v24 = vld [vmem:[%s3364_s11] sm:$0xff]  }
 0x282   :  { %2581 = vmatprep.subr.bf16.mxu0 %v2753_v21 }
 0x285   :  { %2582 = vmatpush3.bf16.msra.mxu0 %v2753_v21 }
 0x286   :  { %2583 = vmatprep.subr.bf16.mxu0 %v2754_v22 }
 0x289   :  { %2584 = vmatpush3.bf16.msra.mxu0 %v2754_v22 }
 0x28a   :  { %2585 = vmatprep.subr.bf16.mxu0 %v2755_v23 }
 0x28d   :  { %2586 = vmatpush3.bf16.msra.mxu0 %v2755_v23 }
 0x28e   :  { %2591 = vmatprep.subr.bf16.mxu0 %v2756_v24 }
 0x343   :  { %v2509_v26 = vpop.f32.mrb[4].mxu0 }
 0x344   :  { %v1307_v27 = vadd.f32 %v2509_v26, %v2118_v25  ;;  %v1279_v28 = vpop.f32.mrb[5].mxu0 }
 0x345   :  { %v1305_v29 = vadd.f32 %v2118_v25, %v1279_v28  ;;  %v2510_v31 = vpop.f32.mrb[6].mxu0 }
 0x346   :  { %v1311_v34 = vmax.f32 %v1307_v27, 0.0  ;;  %v1308_v36 = vadd.f32 %v2510_v31, %v2118_v25  ;;  %v1282_v38 = vpop.f32.mrb[7].mxu0 }
 0x347   :  { %v1309_v41 = vmax.f32 %v1305_v29, 0.0  ;;  %v1306_v43 = vadd.f32 %v2118_v25, %v1282_v38  ;;  %v2175_v25 = vld [vmem:[%s3366_s10] ss:$0 sm:$0xff] }
 0x348   :  { %v1312_v44 = vmax.f32 %v1308_v36, 0.0  ;;  %v1315_v45 = vrot.slane %v1311_v34, 7  ;;  %v1558_v49 = vrot.slane %v1311_v34, 1 }
 0x349   :  { %v1313_v46 = vrot.slane %v1309_v41, 7  ;;  %v1556_v47 = vrot.slane %v1309_v41, 1  ;;  %v1310_v48 = vmax.f32 %v1306_v43, 0.0 }
 0x34a   :  { %v1316_v50 = vrot.slane %v1312_v44, 7  ;;  %v1344_v51 = vpack.c.bf16 %v1312_v44, %v1311_v34  ;;  %v1559_v52 = vrot.slane %v1312_v44, 1 }
 0x34b   :  { %v1314_v53 = vrot.slane %v1310_v48, 7  ;;  %v1557_v54 = vrot.slane %v1310_v48, 1  ;;  %v1343_v55 = vpack.c.bf16 %v1310_v48, %v1309_v41 }
 0x34c   :  { %v1563_v56 = vsel %vm323_vm3, %v1559_v52, %v1556_v47  ;;  %v1320_v59 = vsel %vm130_vm2, %v1316_v50, %v1313_v46  ;;  %v1317_v60 = vsel %vm130_vm2, %v1315_v45, %v1316_v50  ;;  %v3241_v61 = vsel %vm323_vm3, %v1558_v49, %v1559_v52  ;;  %v2757_v52 = vld [vmem:[%s3364_s11 + $0x8] sm:$0xff]  }
 0x34d   :  { %v1318_v62 = vsel %vm130_vm2, %v1314_v53, %v1315_v45  ;;  %2527 = vmatprep.mubr.bf16.mxu1 %v1343_v55  ;;  %v1319_v63 = vsel %vm130_vm2, %v1313_v46, %v1314_v53  ;;  %v1321_v0 = vmul.f32 %v2874_v15, %v1320_v59  ;;  %v1561_v1 = vsel %vm323_vm3, %v1557_v54, %v1558_v49  ;;  %v2734_v15 = vld [vmem:[%s3361_s9 + $0x10] sm:$0xff]   ;;  %v2763_v53 = vld [vmem:[%s3364_s11 + $0x38] sm:$0xff]  }
 0x34e   :  { %2528 = vmatmul.mubr.bf16.vlgmr.msra.gmra.mrb[4].mxu1 %v1344_v51  ;;  %v1323_v2 = vmul.f32 %v2921_v39, %v1318_v62  ;;  %v1562_v4 = vsel %vm323_vm3, %v1556_v47, %v1557_v54  ;;  %v1565_v5 = vmul.f32 %v2929_v42, %v1561_v1  ;;  %v1567_v6 = vmul.f32 %v2961_v57, %v1563_v56  ;;  %v2736_v39 = vld [vmem:[%s3361_s9 + $0x20] sm:$0xff]   ;;  %v2737_v42 = vld [vmem:[%s3361_s9 + $0x28] sm:$0xff]   ;;  %v2738_v57 = vld [vmem:[%s3361_s9 + $0x30] sm:$0xff]  }
 0x34f   :  { %2532 = vmatpush3.bf16.msra.mxu1 %v2732_v19  ;;  %v1325_v7 = vpack.c.bf16 %v1319_v63, %v1321_v0  ;;  %v2746_v19 = vld [vmem:[%s3361_s9 + $0xb0] sm:$0xff]   ;;  %v2208_v54 = vld [vmem:[%s3367_s12] ss:$0 sm:$0xff] }
 0x350   :  { %2533 = vmatprep.subr.bf16.mxu1 %v2733_v58  ;;  %v1326_v8 = vpack.c.bf16 %v1317_v60, %v1323_v2  ;;  %v1568_v9 = vpack.c.bf16 %v1565_v5, %v1562_v4  ;;  %v1569_v10 = vpack.c.bf16 %v1567_v6, %v3241_v61 }
 0x351   :  { %2547 = vmatprep.mubr.bf16.mxu1 %v1325_v7 }
 0x353   :  { %2534 = vmatpush3.bf16.msra.mxu1 %v2733_v58 }
 0x354   :  { %2535 = vmatprep.subr.bf16.mxu1 %v2734_v15 }
 0x357   :  { %2536 = vmatpush3.bf16.msra.mxu1 %v2734_v15 }
 0x358   :  { %2537 = vmatprep.subr.bf16.mxu1 %v2735_v3 }
 0x35b   :  { %2538 = vmatpush3.bf16.msra.mxu1 %v2735_v3 }
 0x35c   :  { %2539 = vmatprep.subr.bf16.mxu1 %v2736_v39 }
 0x35f   :  { %2540 = vmatpush3.bf16.msra.mxu1 %v2736_v39 }
 0x360   :  { %2541 = vmatprep.subr.bf16.mxu1 %v2737_v42 }
 0x363   :  { %2542 = vmatpush3.bf16.msra.mxu1 %v2737_v42 }
 0x364   :  { %2543 = vmatprep.subr.bf16.mxu1 %v2738_v57 }
 0x367   :  { %2544 = vmatpush3.bf16.msra.mxu1 %v2738_v57 }
 0x368   :  { %2545 = vmatprep.subr.bf16.mxu1 %v2739_v11 }
 0x36b   :  { %2546 = vmatpush3.bf16.msra.mxu1 %v2739_v11 }
 0x36c   :  { %2551 = vmatprep.subr.bf16.mxu1 %v2740_v12 }
 0x36e   :  { %2548 = vmatmul.mubr.bf16.vlgmr.msra.gmra.mrb[4].mxu1 %v1326_v8 }
 0x36f   :  { %2552 = vmatpush3.bf16.msra.mxu1 %v2740_v12  ;;  %2567 = vmatprep.mubr.bf16.mxu1 %v1568_v9 }
 0x370   :  { %2553 = vmatprep.subr.bf16.mxu1 %v2741_v13 }
 0x373   :  { %2554 = vmatpush3.bf16.msra.mxu1 %v2741_v13 }
 0x374   :  { %2555 = vmatprep.subr.bf16.mxu1 %v2742_v14 }
 0x377   :  { %2556 = vmatpush3.bf16.msra.mxu1 %v2742_v14 }
 0x378   :  { %2557 = vmatprep.subr.bf16.mxu1 %v2743_v16 }
 0x37b   :  { %2558 = vmatpush3.bf16.msra.mxu1 %v2743_v16 }
 0x37c   :  { %2559 = vmatprep.subr.bf16.mxu1 %v2744_v17 }
 0x37f   :  { %2560 = vmatpush3.bf16.msra.mxu1 %v2744_v17 }
 0x380   :  { %2561 = vmatprep.subr.bf16.mxu1 %v2745_v18 }
 0x383   :  { %2562 = vmatpush3.bf16.msra.mxu1 %v2745_v18 }
 0x384   :  { %2563 = vmatprep.subr.bf16.mxu1 %v2746_v19 }
 0x387   :  { %2564 = vmatpush3.bf16.msra.mxu1 %v2746_v19 }
 0x388   :  { %2565 = vmatprep.subr.bf16.mxu1 %v2747_v20 }
 0x38b   :  { %2566 = vmatpush3.bf16.msra.mxu1 %v2747_v20 }
 0x38e   :  { %2568 = vmatmul.mubr.bf16.vlgmr.msra.gmra.mrb[4].mxu1 %v1569_v10 }
 0x461   :  { %v2569_v26 = vpop.f32.mrb[4].mxu1 }
 0x462   :  { %v1697_v27 = vadd.f32 %v2569_v26, %v2175_v25  ;;  %v1669_v28 = vpop.f32.mrb[5].mxu1 }
 0x463   :  { %v1695_v29 = vadd.f32 %v2175_v25, %v1669_v28  ;;  %v2570_v31 = vpop.f32.mrb[6].mxu1 }
 0x464   :  { %v1701_v34 = vadd.f32 %v1697_v27, %v3119_v35  ;;  %v1698_v36 = vadd.f32 %v2570_v31, %v2175_v25  ;;  %v1672_v38 = vpop.f32.mrb[7].mxu1  ;;  %v2761_v35 = vld [vmem:[%s3364_s11 + $0x28] sm:$0xff]  }
 0x465   :  { %v1699_v41 = vadd.f32 %v1695_v29, %v3112_v30  ;;  %v1696_v43 = vadd.f32 %v2175_v25, %v1672_v38  ;;  %v2758_v30 = vld [vmem:[%s3364_s11 + $0x10] sm:$0xff]  }
 0x466   :  { %v1702_v44 = vadd.f32 %v1698_v36, %v3114_v32  ;;  %v1705_v46 = vmax.f32 %v1701_v34, 0.0  ;;  %v2759_v32 = vld [vmem:[%s3364_s11 + $0x18] sm:$0xff]  }
 0x467   :  { %v1700_v45 = vadd.f32 %v1696_v43, %v3116_v33  ;;  %v1703_v48 = vmax.f32 %v1699_v41, 0.0  ;;  %v2760_v33 = vld [vmem:[%s3364_s11 + $0x20] sm:$0xff]  }
 0x468   :  { %v1706_v47 = vmax.f32 %v1702_v44, 0.0 }
 0x469   :  { %v1704_v49 = vmax.f32 %v1700_v45, 0.0 }
 0x46a   :  { %v1724_v50 = vpack.c.bf16 %v1706_v47, %v1705_v46 }
 0x46b   :  { %v1723_v51 = vpack.c.bf16 %v1704_v49, %v1703_v48 }
 0x46d   :  { %2587 = vmatprep.mubr.bf16.mxu0 %v1723_v51 }
 0x46e   :  { %2588 = vmatmul.mubr.bf16.vlgmr.msra.gmra.mrb[8].mxu0 %v1724_v50 }
 0x46f   :  { %2592 = vmatpush3.bf16.msra.mxu0 %v2756_v24  ;;  %2607 = vmatprep.mubr.bf16.mxu0 %v3124_v37  ;;  %v2762_v37 = vld [vmem:[%s3364_s11 + $0x30] sm:$0xff]  }
 0x470   :  { %2593 = vmatprep.subr.bf16.mxu0 %v2757_v52 }
 0x473   :  { %2594 = vmatpush3.bf16.msra.mxu0 %v2757_v52 }
 0x474   :  { %2595 = vmatprep.subr.bf16.mxu0 %v2758_v30 }
 0x477   :  { %2596 = vmatpush3.bf16.msra.mxu0 %v2758_v30 }
 0x478   :  { %2597 = vmatprep.subr.bf16.mxu0 %v2759_v32 }
 0x47b   :  { %2598 = vmatpush3.bf16.msra.mxu0 %v2759_v32 }
 0x47c   :  { %2599 = vmatprep.subr.bf16.mxu0 %v2760_v33 }
 0x47f   :  { %2600 = vmatpush3.bf16.msra.mxu0 %v2760_v33 }
 0x480   :  { %2601 = vmatprep.subr.bf16.mxu0 %v2761_v35 }
 0x483   :  { %2602 = vmatpush3.bf16.msra.mxu0 %v2761_v35 }
 0x484   :  { %2603 = vmatprep.subr.bf16.mxu0 %v2762_v37 }
 0x487   :  { %2604 = vmatpush3.bf16.msra.mxu0 %v2762_v37 }
 0x488   :  { %2605 = vmatprep.subr.bf16.mxu0 %v2763_v53 }
 0x48b   :  { %2606 = vmatpush3.bf16.msra.mxu0 %v2763_v53 }
 0x48e   :  { %2608 = vmatmul.mubr.bf16.vlgmr.msra.gmra.mrb[8].mxu0 %v3129_v40 }
 0x561   :  { %v2609_v55 = vpop.f32.mrb[8].mxu0 }
 0x562   :  { %v1945_v56 = vadd.f32 %v2609_v55, %v2208_v54  ;;  %v1921_v58 = vpop.f32.mrb[9].mxu0 }
 0x563   :  { %v1943_v59 = vadd.f32 %v2208_v54, %v1921_v58  ;;  %v2610_v60 = vpop.f32.mrb[10].mxu0 }
 0x564   :  { %v1949_v61 = vmax.f32 %v1945_v56, 0.0  ;;  %v1946_v62 = vadd.f32 %v2610_v60, %v2208_v54  ;;  %v1924_v63 = vpop.f32.mrb[11].mxu0 }
 0x565   :  { %v1947_v0 = vmax.f32 %v1943_v59, 0.0  ;;  %v1944_v1 = vadd.f32 %v2208_v54, %v1924_v63 }
 0x566   :  { %1953 = vst [vmem:[%s3368_s13 + $0x10] sm:$0xff] %v1949_v61  ;;  %v1950_v2 = vmax.f32 %v1946_v62, 0.0 }
 0x567   :  { %1951 = vst [vmem:[%s3368_s13] sm:$0xff] %v1947_v0  ;;  %v1948_v40 = vmax.f32 %v1944_v1, 0.0 }
 0x568   :  { %1954 = vst [vmem:[%s3368_s13 + $0x18] sm:$0xff] %v1950_v2 }
 0x569   :  { %1952 = vst [vmem:[%s3368_s13 + $0x8] sm:$0xff] %v1948_v40 }

</bundles_post_ra>
